<compile_context>
chip_gen: v7x
topology: tpu7x:2x2x1
jax: 0.10.0
libtpu: 0.0.40
codegen_flags: <defaults>
</compile_context>

<pallas_src>
import functools
import jax
import jax.numpy as jnp
from jax.experimental import pallas as pl
from jax.experimental.pallas import tpu as pltpu

IMAGE = 28
PATCH = 14
IN_CH = 3
NUM_CLASSES = 10
HEAD_PAD = 128          # lane-dense logits; sliced back to 10 in the wrapper
LN_EPS = 1e-6           # torchvision ViT uses LayerNorm(eps=1e-6)
NEG_BIG = -1e9          # additive mask for cross-image attention pairs


# ---------------------------------------------------------------------------
# in-kernel math helpers (all f32 VPU math; only matmul operands are bf16)
# ---------------------------------------------------------------------------
def _layer_norm(x, w, b):
    mu = jnp.mean(x, axis=-1, keepdims=True)
    xc = x - mu
    var = jnp.mean(xc * xc, axis=-1, keepdims=True)
    return xc * jax.lax.rsqrt(var + LN_EPS) * w + b


def _gelu_tanh(x):
    # tanh-approx GELU: tanh goes to the EUP slot; well within the 5e-2 test
    # tolerance versus torch's exact (erf) GELU.
    c = 0.7978845608028654  # sqrt(2/pi)
    return 0.5 * x * (1.0 + jnp.tanh(c * (x + 0.044715 * x * x * x)))


# ---------------------------------------------------------------------------
# the fused ViT kernel (one block of b_tile images per grid step)
# ---------------------------------------------------------------------------
def vit_kernel(num_layers, num_heads,
               patches_ref, bias_ref, pos_ref, convw_ref,
               ln1w_ref, ln1b_ref, qkvw_ref, qkvb_ref, outw_ref, outb_ref,
               ln2w_ref, ln2b_ref, w1_ref, b1_ref, w2_ref, b2_ref,
               lnfw_ref, lnfb_ref, headw_ref, headb_ref,
               out_ref):
    D = convw_ref.shape[1]
    H = num_heads
    Dh = D // H

    # block-diagonal additive attention bias, hoisted out of the layer loop
    attn_bias = bias_ref[...]                                   # (BS, BS) f32

    # patch embedding: class token, conv bias and positional embedding are all
    # folded into pos_ref by the wrapper; softmax scale is folded into q cols.
    x = jnp.dot(patches_ref[...], convw_ref[...],
                preferred_element_type=jnp.float32) + pos_ref[...]   # (BS, D)

    for l in range(num_layers):
        # ---------------- multi-head self-attention block ----------------
        y = _layer_norm(x, ln1w_ref[l], ln1b_ref[l])
        qkv = jnp.dot(y.astype(jnp.bfloat16), qkvw_ref[l],
                      preferred_element_type=jnp.float32) + qkvb_ref[l]  # (BS, 3D)

        ctx_parts = []
        for h in range(H):
            qh = qkv[:, h * Dh:(h + 1) * Dh].astype(jnp.bfloat16)
            kh = qkv[:, D + h * Dh:D + (h + 1) * Dh].astype(jnp.bfloat16)
            vh = qkv[:, 2 * D + h * Dh:2 * D + (h + 1) * Dh].astype(jnp.bfloat16)
            # whole-block scores with block-diagonal mask: cross-image pairs
            # get -1e9 and exp() exactly to zero, so each image only attends
            # to its own S tokens (no in-kernel reshape / per-image loop).
            s = jax.lax.dot_general(qh, kh, (((1,), (1,)), ((), ())),
                                    preferred_element_type=jnp.float32)
            s = s + attn_bias
            s = s - jnp.max(s, axis=-1, keepdims=True)
            p = jnp.exp(s)
            p = p * pl.reciprocal(jnp.sum(p, axis=-1, keepdims=True), approx=True)
            ctx_parts.append(jnp.dot(p.astype(jnp.bfloat16), vh,
                                     preferred_element_type=jnp.float32))
        ctx = jnp.concatenate(ctx_parts, axis=-1) if H > 1 else ctx_parts[0]
        # single out-projection matmul per layer (concatenated heads)
        x = x + jnp.dot(ctx.astype(jnp.bfloat16), outw_ref[l],
                        preferred_element_type=jnp.float32) + outb_ref[l]

        # ---------------------------- MLP block ---------------------------
        y = _layer_norm(x, ln2w_ref[l], ln2b_ref[l])
        h1 = jnp.dot(y.astype(jnp.bfloat16), w1_ref[l],
                     preferred_element_type=jnp.float32) + b1_ref[l]
        h1 = _gelu_tanh(h1)
        x = x + jnp.dot(h1.astype(jnp.bfloat16), w2_ref[l],
                        preferred_element_type=jnp.float32) + b2_ref[l]

    # final LayerNorm + classification head on every token row (lane-dense
    # 128-wide store); the wrapper keeps only the class-token rows / 10 cols.
    x = _layer_norm(x, lnfw_ref[...], lnfb_ref[...])
    logits = jnp.dot(x.astype(jnp.bfloat16), headw_ref[...],
                     preferred_element_type=jnp.float32) + headb_ref[...]
    out_ref[...] = logits.astype(out_ref.dtype)


# ---------------------------------------------------------------------------
# wrapper: patch extraction + parameter folding/padding + pallas_call
# ---------------------------------------------------------------------------
def make_vit_forward(num_layers, num_heads, hidden_dim, mlp_dim, batch,
                     b_tile=None):
    D, M, L = hidden_dim, mlp_dim, num_layers
    S = (IMAGE // PATCH) ** 2 + 1                  # 5 tokens (class + 4 patches)
    Cp = IN_CH * PATCH * PATCH                     # 588
    Cp_pad = ((Cp + 127) // 128) * 128             # 640: MXU-aligned K

    if b_tile is None:
        # 32 images/step -> 160 token rows per matmul (>=128 MXU rows).  For
        # multi-step grids b_tile stays a multiple of 8 so the flat 2-D block
        # rows remain sublane aligned; a single step can use any row count.
        b_tile = batch if batch <= 32 else 32
    n_blocks = -(-batch // b_tile)
    n_pad = n_blocks * b_tile
    BS = b_tile * S

    kernel = functools.partial(vit_kernel, num_layers, num_heads)

    def full(shape):
        nd = len(shape)
        return pl.BlockSpec(shape, lambda n, _nd=nd: (0,) * _nd)

    in_specs = [
        pl.BlockSpec((BS, Cp_pad), lambda n: (n, 0)),    # flattened patch rows
        full((BS, BS)),                                  # block-diag attn bias
        full((BS, D)),                                   # pos (+cls/conv_b), tiled
        full((Cp_pad, D)),                               # conv_proj weight
        full((L, 1, D)), full((L, 1, D)),                # ln_1 w/b
        full((L, D, 3 * D)), full((L, 1, 3 * D)),        # attn in_proj (q scaled)
        full((L, D, D)), full((L, 1, D)),                # attn out_proj
        full((L, 1, D)), full((L, 1, D)),                # ln_2 w/b
        full((L, D, M)), full((L, 1, M)),                # mlp linear_1
        full((L, M, D)), full((L, 1, D)),                # mlp linear_2
        full((1, D)), full((1, D)),                      # encoder final ln
        full((D, HEAD_PAD)), full((1, HEAD_PAD)),        # heads.head (padded)
    ]
    out_spec = pl.BlockSpec((BS, HEAD_PAD), lambda n: (n, 0))

    call = pl.pallas_call(
        kernel,
        out_shape=jax.ShapeDtypeStruct((n_pad * S, HEAD_PAD), jnp.float32),
        grid_spec=pltpu.PrefetchScalarGridSpec(
            num_scalar_prefetch=0,
            grid=(n_blocks,),
            in_specs=in_specs,
            out_specs=out_spec,
        ),
        compiler_params=pltpu.CompilerParams(
            dimension_semantics=("parallel",)),
    )

    nh = IMAGE // PATCH
    Dh = D // num_heads
    scale = 1.0 / float(Dh) ** 0.5

    def forward(x, kp):
        assert x.shape[0] == batch
        # ------- patch extraction (same order as torch conv flattening) -----
        patches = x.reshape(batch, IN_CH, nh, PATCH, nh, PATCH)
        patches = patches.transpose(0, 2, 4, 1, 3, 5).reshape(batch, S - 1, Cp)
        # zero row at token 0 (class-token slot; handled via pos folding)
        patches = jnp.concatenate(
            [jnp.zeros((batch, 1, Cp), patches.dtype), patches], axis=1)
        if n_pad > batch:
            patches = jnp.concatenate(
                [patches, jnp.zeros((n_pad - batch, S, Cp), patches.dtype)],
                axis=0)
        patches = jnp.pad(patches, ((0, 0), (0, 0), (0, Cp_pad - Cp)))
        patches = patches.reshape(n_pad * S, Cp_pad).astype(jnp.bfloat16)

        # ------- parameter folding / padding / bf16 casts -------------------
        # class token and conv bias folded into the positional embedding
        pos_eff = kp['pos'] + kp['conv_b']                       # (S, D)
        pos_eff = pos_eff.at[0].set(kp['pos'][0] + kp['cls'][0])
        pos_tiled = jnp.tile(pos_eff, (b_tile, 1))               # (BS, D) f32

        # block-diagonal additive attention mask (same for every grid step)
        img = jnp.arange(BS, dtype=jnp.int32) // S
        bias = jnp.where(img[:, None] == img[None, :],
                         0.0, NEG_BIG).astype(jnp.float32)       # (BS, BS)

        # fold 1/sqrt(Dh) into the q columns of the in-projection
        qscale = jnp.concatenate([jnp.full((D,), scale, jnp.float32),
                                  jnp.ones((2 * D,), jnp.float32)])
        qkvw = (kp['qkvw'] * qscale).astype(jnp.bfloat16)        # (L, D, 3D)
        qkvb = kp['qkvb'] * qscale                               # f32

        conv_w = jnp.pad(kp['conv_w'],
                         ((0, Cp_pad - Cp), (0, 0))).astype(jnp.bfloat16)
        headw = jnp.pad(kp['headw'],
                        ((0, 0), (0, HEAD_PAD - NUM_CLASSES))).astype(jnp.bfloat16)
        headb = jnp.pad(kp['headb'], ((0, 0), (0, HEAD_PAD - NUM_CLASSES)))

        out = call(patches, bias, pos_tiled, conv_w,
                   kp['ln1w'], kp['ln1b'], qkvw, qkvb,
                   kp['outw'].astype(jnp.bfloat16), kp['outb'],
                   kp['ln2w'], kp['ln2b'],
                   kp['w1'].astype(jnp.bfloat16), kp['b1'],
                   kp['w2'].astype(jnp.bfloat16), kp['b2'],
                   kp['lnfw'], kp['lnfb'], headw, headb)
        # keep class-token row of each real image, first NUM_CLASSES columns
        out = out.reshape(n_pad, S, HEAD_PAD)[:batch, 0, :NUM_CLASSES]
        return out

    return forward


# ---------------------------------------------------------------------------
# deterministic parameter init (torch layouts, then transposed for the kernel)
# ---------------------------------------------------------------------------
def init_params(key, num_layers, num_heads, hidden_dim, mlp_dim):
    D, M, L = hidden_dim, mlp_dim, num_layers
    Cp = IN_CH * PATCH * PATCH
    S = (IMAGE // PATCH) ** 2 + 1
    ks = iter(jax.random.split(key, 5 + 8 * L))

    def nrm(shape, std=0.02):
        return jax.random.normal(next(ks), shape, jnp.float32) * std

    conv_w = nrm((D, IN_CH, PATCH, PATCH))          # torch conv_proj.weight
    conv_b = nrm((D,))
    cls = jnp.zeros((1, D), jnp.float32)            # torch init: zeros
    pos = nrm((S, D))

    qkvw, qkvb, outw, outb, w1, b1, w2, b2 = [], [], [], [], [], [], [], []
    for _ in range(L):
        qkvw.append(nrm((3 * D, D)))                # in_proj_weight
        qkvb.append(nrm((3 * D,)))
        outw.append(nrm((D, D)))                    # out_proj.weight
        outb.append(nrm((D,)))
        w1.append(nrm((M, D)))
        b1.append(nrm((M,)))
        w2.append(nrm((D, M)))
        b2.append(nrm((D,)))
    headw = nrm((NUM_CLASSES, D))
    headb = nrm((NUM_CLASSES,))

    return {
        'conv_w': conv_w.reshape(D, Cp).T,                       # (Cp, D)
        'conv_b': conv_b.reshape(1, D),
        'cls': cls,                                              # (1, D)
        'pos': pos,                                              # (S, D)
        'ln1w': jnp.ones((L, 1, D), jnp.float32),
        'ln1b': jnp.zeros((L, 1, D), jnp.float32),
        'qkvw': jnp.transpose(jnp.stack(qkvw), (0, 2, 1)),       # (L, D, 3D)
        'qkvb': jnp.stack(qkvb).reshape(L, 1, 3 * D),
        'outw': jnp.transpose(jnp.stack(outw), (0, 2, 1)),       # (L, D, D)
        'outb': jnp.stack(outb).reshape(L, 1, D),
        'ln2w': jnp.ones((L, 1, D), jnp.float32),
        'ln2b': jnp.zeros((L, 1, D), jnp.float32),
        'w1': jnp.transpose(jnp.stack(w1), (0, 2, 1)),           # (L, D, M)
        'b1': jnp.stack(b1).reshape(L, 1, M),
        'w2': jnp.transpose(jnp.stack(w2), (0, 2, 1)),           # (L, M, D)
        'b2': jnp.stack(b2).reshape(L, 1, D),
        'lnfw': jnp.ones((1, D), jnp.float32),
        'lnfb': jnp.zeros((1, D), jnp.float32),
        'headw': headw.T,                                        # (D, 10)
        'headb': headb.reshape(1, NUM_CLASSES),
    }


# ---------------------------------------------------------------------------
# pure-JAX reference (torchvision ViT semantics) for validation
# ---------------------------------------------------------------------------
def reference_forward(x, kp, num_layers, num_heads):
    N = x.shape[0]
    nh = IMAGE // PATCH
    Cp = IN_CH * PATCH * PATCH
    D = kp['conv_w'].shape[1]
    Dh = D // num_heads

    patches = x.reshape(N, IN_CH, nh, PATCH, nh, PATCH)
    patches = patches.transpose(0, 2, 4, 1, 3, 5).reshape(N, nh * nh, Cp)
    pe = patches @ kp['conv_w'] + kp['conv_b']
    cls = jnp.broadcast_to(kp['cls'][None], (N, 1, D))
    xx = jnp.concatenate([cls, pe], axis=1) + kp['pos'][None]

    def ln(z, w, b):
        mu = z.mean(-1, keepdims=True)
        var = ((z - mu) ** 2).mean(-1, keepdims=True)
        return (z - mu) / jnp.sqrt(var + LN_EPS) * w + b

    for l in range(num_layers):
        y = ln(xx, kp['ln1w'][l], kp['ln1b'][l])
        qkv = y @ kp['qkvw'][l] + kp['qkvb'][l]
        q, k, v = qkv[..., :D], qkv[..., D:2 * D], qkv[..., 2 * D:]
        q = q.reshape(N, -1, num_heads, Dh).transpose(0, 2, 1, 3)
        k = k.reshape(N, -1, num_heads, Dh).transpose(0, 2, 1, 3)
        v = v.reshape(N, -1, num_heads, Dh).transpose(0, 2, 1, 3)
        s = jnp.einsum('nhqd,nhkd->nhqk', q, k) / jnp.sqrt(float(Dh))
        a = jax.nn.softmax(s, axis=-1)
        ctx = jnp.einsum('nhqk,nhkd->nhqd', a, v).transpose(0, 2, 1, 3).reshape(N, -1, D)
        xx = xx + ctx @ kp['outw'][l] + kp['outb'][l]
        y = ln(xx, kp['ln2w'][l], kp['ln2b'][l])
        h1 = y @ kp['w1'][l] + kp['b1'][l]
        h1 = 0.5 * h1 * (1.0 + jax.lax.erf(h1 / jnp.sqrt(2.0)))   # exact GELU
        xx = xx + h1 @ kp['w2'][l] + kp['b2'][l]

    xx = ln(xx, kp['lnfw'], kp['lnfb'])
    return xx[:, 0] @ kp['headw'] + kp['headb']


# ---------------------------------------------------------------------------
if __name__ == "__main__":
    num_heads, num_layers, mlp_dim, hidden_dim = 2, 2, 64, 32
    batch = 2

    key = jax.random.PRNGKey(0)
    kx, kparams = jax.random.split(key)
    x = jax.random.normal(kx, (batch, IN_CH, IMAGE, IMAGE), jnp.float32)
    kp = init_params(kparams, num_layers, num_heads, hidden_dim, mlp_dim)

    forward = make_vit_forward(num_layers, num_heads, hidden_dim, mlp_dim, batch)
    out = jax.block_until_ready(forward(x, kp))

    ref = jax.block_until_ready(
        reference_forward(x, kp, num_layers, num_heads))

    assert out.shape == (batch, NUM_CLASSES)
    assert bool(jnp.all(jnp.isfinite(out)))
    max_diff = float(jnp.max(jnp.abs(out - ref)))
    assert max_diff < 5e-2, f"kernel/reference mismatch: {max_diff}"
    print("KERNEL_OK")
</pallas_src>

<mosaic_0001>
module attributes {stable_mosaic.version = 11 : i64} {
  func.func @vit_kernel(%arg0: i32, %arg1: memref<10x640xbf16, #tpu.memory_space<vmem>>, %arg2: memref<10x10xf32, #tpu.memory_space<vmem>>, %arg3: memref<10x32xf32, #tpu.memory_space<vmem>>, %arg4: memref<640x32xbf16, #tpu.memory_space<vmem>>, %arg5: memref<2x1x32xf32, #tpu.memory_space<vmem>>, %arg6: memref<2x1x32xf32, #tpu.memory_space<vmem>>, %arg7: memref<2x32x96xbf16, #tpu.memory_space<vmem>>, %arg8: memref<2x1x96xf32, #tpu.memory_space<vmem>>, %arg9: memref<2x32x32xbf16, #tpu.memory_space<vmem>>, %arg10: memref<2x1x32xf32, #tpu.memory_space<vmem>>, %arg11: memref<2x1x32xf32, #tpu.memory_space<vmem>>, %arg12: memref<2x1x32xf32, #tpu.memory_space<vmem>>, %arg13: memref<2x32x64xbf16, #tpu.memory_space<vmem>>, %arg14: memref<2x1x64xf32, #tpu.memory_space<vmem>>, %arg15: memref<2x64x32xbf16, #tpu.memory_space<vmem>>, %arg16: memref<2x1x32xf32, #tpu.memory_space<vmem>>, %arg17: memref<1x32xf32, #tpu.memory_space<vmem>>, %arg18: memref<1x32xf32, #tpu.memory_space<vmem>>, %arg19: memref<32x128xbf16, #tpu.memory_space<vmem>>, %arg20: memref<1x128xf32, #tpu.memory_space<vmem>>, %arg21: memref<10x128xf32, #tpu.memory_space<vmem>>) attributes {dimension_semantics = [#tpu.dimension_semantics<parallel>], iteration_bounds = array<i64: 1>, scalar_prefetch = 0 : i64, scratch_operands = 0 : i64, tpu.core_type = #tpu.core_type<tc>, window_params = [{transform_indices = @transform_0, window_bounds = array<i64: 10, 640>}, {pipeline_mode = #tpu.pipeline_mode<synchronous>, transform_indices = @transform_1, window_bounds = array<i64: 10, 10>}, {pipeline_mode = #tpu.pipeline_mode<synchronous>, transform_indices = @transform_2, window_bounds = array<i64: 10, 32>}, {pipeline_mode = #tpu.pipeline_mode<synchronous>, transform_indices = @transform_3, window_bounds = array<i64: 640, 32>}, {pipeline_mode = #tpu.pipeline_mode<synchronous>, transform_indices = @transform_4, window_bounds = array<i64: 2, 1, 32>}, {pipeline_mode = #tpu.pipeline_mode<synchronous>, transform_indices = @transform_5, window_bounds = array<i64: 2, 1, 32>}, {pipeline_mode = #tpu.pipeline_mode<synchronous>, transform_indices = @transform_6, window_bounds = array<i64: 2, 32, 96>}, {pipeline_mode = #tpu.pipeline_mode<synchronous>, transform_indices = @transform_7, window_bounds = array<i64: 2, 1, 96>}, {pipeline_mode = #tpu.pipeline_mode<synchronous>, transform_indices = @transform_8, window_bounds = array<i64: 2, 32, 32>}, {pipeline_mode = #tpu.pipeline_mode<synchronous>, transform_indices = @transform_9, window_bounds = array<i64: 2, 1, 32>}, {pipeline_mode = #tpu.pipeline_mode<synchronous>, transform_indices = @transform_10, window_bounds = array<i64: 2, 1, 32>}, {pipeline_mode = #tpu.pipeline_mode<synchronous>, transform_indices = @transform_11, window_bounds = array<i64: 2, 1, 32>}, {pipeline_mode = #tpu.pipeline_mode<synchronous>, transform_indices = @transform_12, window_bounds = array<i64: 2, 32, 64>}, {pipeline_mode = #tpu.pipeline_mode<synchronous>, transform_indices = @transform_13, window_bounds = array<i64: 2, 1, 64>}, {pipeline_mode = #tpu.pipeline_mode<synchronous>, transform_indices = @transform_14, window_bounds = array<i64: 2, 64, 32>}, {pipeline_mode = #tpu.pipeline_mode<synchronous>, transform_indices = @transform_15, window_bounds = array<i64: 2, 1, 32>}, {pipeline_mode = #tpu.pipeline_mode<synchronous>, transform_indices = @transform_16, window_bounds = array<i64: 1, 32>}, {pipeline_mode = #tpu.pipeline_mode<synchronous>, transform_indices = @transform_17, window_bounds = array<i64: 1, 32>}, {pipeline_mode = #tpu.pipeline_mode<synchronous>, transform_indices = @transform_18, window_bounds = array<i64: 32, 128>}, {pipeline_mode = #tpu.pipeline_mode<synchronous>, transform_indices = @transform_19, window_bounds = array<i64: 1, 128>}, {transform_indices = @transform_20, window_bounds = array<i64: 10, 128>}]} {
    %c0 = arith.constant 0 : index
    %c0_0 = arith.constant 0 : index
    %0 = vector.load %arg2[%c0, %c0_0] : memref<10x10xf32, #tpu.memory_space<vmem>>, vector<10x10xf32>
    %c0_1 = arith.constant 0 : index
    %c0_2 = arith.constant 0 : index
    %1 = vector.load %arg1[%c0_1, %c0_2] : memref<10x640xbf16, #tpu.memory_space<vmem>>, vector<10x640xbf16>
    %c0_3 = arith.constant 0 : index
    %c0_4 = arith.constant 0 : index
    %2 = vector.load %arg4[%c0_3, %c0_4] : memref<640x32xbf16, #tpu.memory_space<vmem>>, vector<640x32xbf16>
    %cst = arith.constant dense<0.000000e+00> : vector<10x32xf32>
    %3 = tpu.matmul %1, %2, %cst {dimension_numbers = #tpu.dot_dimension_numbers<[1], [0], [0], [1], [0, 0, 1, 1], [], []>} : vector<10x640xbf16>, vector<640x32xbf16>, vector<10x32xf32> -> vector<10x32xf32>
    %c0_5 = arith.constant 0 : index
    %c0_6 = arith.constant 0 : index
    %4 = vector.load %arg3[%c0_5, %c0_6] : memref<10x32xf32, #tpu.memory_space<vmem>>, vector<10x32xf32>
    %5 = arith.addf %3, %4 : vector<10x32xf32>
    %c0_7 = arith.constant 0 : index
    %c0_8 = arith.constant 0 : index
    %c0_9 = arith.constant 0 : index
    %6 = vector.load %arg5[%c0_7, %c0_8, %c0_9] : memref<2x1x32xf32, #tpu.memory_space<vmem>>, vector<1x1x32xf32>
    %7 = vector.shape_cast %6 : vector<1x1x32xf32> to vector<1x32xf32>
    %c0_10 = arith.constant 0 : index
    %c0_11 = arith.constant 0 : index
    %c0_12 = arith.constant 0 : index
    %8 = vector.load %arg6[%c0_10, %c0_11, %c0_12] : memref<2x1x32xf32, #tpu.memory_space<vmem>>, vector<1x1x32xf32>
    %9 = vector.shape_cast %8 : vector<1x1x32xf32> to vector<1x32xf32>
    %cst_13 = arith.constant dense<0.000000e+00> : vector<10xf32>
    %10 = vector.multi_reduction <add>, %5, %cst_13 [1] : vector<10x32xf32> to vector<10xf32>
    %11 = vector.shape_cast %10 : vector<10xf32> to vector<10x1xf32>
    %cst_14 = arith.constant 3.200000e+01 : f32
    %12 = vector.broadcast %cst_14 : f32 to vector<10x1xf32>
    %13 = arith.divf %11, %12 : vector<10x1xf32>
    %14 = vector.broadcast %13 : vector<10x1xf32> to vector<10x32xf32>
    %15 = arith.subf %5, %14 : vector<10x32xf32>
    %16 = arith.mulf %15, %15 : vector<10x32xf32>
    %cst_15 = arith.constant dense<0.000000e+00> : vector<10xf32>
    %17 = vector.multi_reduction <add>, %16, %cst_15 [1] : vector<10x32xf32> to vector<10xf32>
    %18 = vector.shape_cast %17 : vector<10xf32> to vector<10x1xf32>
    %cst_16 = arith.constant 3.200000e+01 : f32
    %19 = vector.broadcast %cst_16 : f32 to vector<10x1xf32>
    %20 = arith.divf %18, %19 : vector<10x1xf32>
    %cst_17 = arith.constant 9.99999997E-7 : f32
    %21 = vector.broadcast %cst_17 : f32 to vector<10x1xf32>
    %22 = arith.addf %20, %21 : vector<10x1xf32>
    %23 = math.rsqrt %22 : vector<10x1xf32>
    %24 = vector.broadcast %23 : vector<10x1xf32> to vector<10x32xf32>
    %25 = arith.mulf %15, %24 : vector<10x32xf32>
    %26 = vector.broadcast %7 : vector<1x32xf32> to vector<10x32xf32>
    %27 = arith.mulf %25, %26 : vector<10x32xf32>
    %28 = vector.broadcast %9 : vector<1x32xf32> to vector<10x32xf32>
    %29 = arith.addf %27, %28 : vector<10x32xf32>
    %30 = arith.truncf %29 : vector<10x32xf32> to vector<10x32xbf16>
    %c0_18 = arith.constant 0 : index
    %c0_19 = arith.constant 0 : index
    %c0_20 = arith.constant 0 : index
    %31 = vector.load %arg7[%c0_18, %c0_19, %c0_20] : memref<2x32x96xbf16, #tpu.memory_space<vmem>>, vector<1x32x96xbf16>
    %32 = vector.shape_cast %31 : vector<1x32x96xbf16> to vector<32x96xbf16>
    %cst_21 = arith.constant dense<0.000000e+00> : vector<10x96xf32>
    %33 = tpu.matmul %30, %32, %cst_21 {dimension_numbers = #tpu.dot_dimension_numbers<[1], [0], [0], [1], [0, 0, 1, 1], [], []>} : vector<10x32xbf16>, vector<32x96xbf16>, vector<10x96xf32> -> vector<10x96xf32>
    %c0_22 = arith.constant 0 : index
    %c0_23 = arith.constant 0 : index
    %c0_24 = arith.constant 0 : index
    %34 = vector.load %arg8[%c0_22, %c0_23, %c0_24] : memref<2x1x96xf32, #tpu.memory_space<vmem>>, vector<1x1x96xf32>
    %35 = vector.shape_cast %34 : vector<1x1x96xf32> to vector<1x96xf32>
    %36 = vector.broadcast %35 : vector<1x96xf32> to vector<10x96xf32>
    %37 = arith.addf %33, %36 : vector<10x96xf32>
    %38 = vector.extract_strided_slice %37 {offsets = [0, 0], sizes = [10, 16], strides = [1, 1]} : vector<10x96xf32> to vector<10x16xf32>
    %39 = arith.truncf %38 : vector<10x16xf32> to vector<10x16xbf16>
    %40 = vector.extract_strided_slice %37 {offsets = [0, 32], sizes = [10, 16], strides = [1, 1]} : vector<10x96xf32> to vector<10x16xf32>
    %41 = arith.truncf %40 : vector<10x16xf32> to vector<10x16xbf16>
    %42 = vector.extract_strided_slice %37 {offsets = [0, 64], sizes = [10, 16], strides = [1, 1]} : vector<10x96xf32> to vector<10x16xf32>
    %43 = arith.truncf %42 : vector<10x16xf32> to vector<10x16xbf16>
    %cst_25 = arith.constant dense<0.000000e+00> : vector<10x10xf32>
    %44 = tpu.matmul %39, %41, %cst_25 {dimension_numbers = #tpu.dot_dimension_numbers<[1], [1], [0], [0], [0, 0, 1, 0], [], []>} : vector<10x16xbf16>, vector<10x16xbf16>, vector<10x10xf32> -> vector<10x10xf32>
    %45 = arith.addf %44, %0 : vector<10x10xf32>
    %cst_26 = arith.constant dense<0xFF800000> : vector<10xf32>
    %46 = vector.multi_reduction <maximumf>, %45, %cst_26 [1] : vector<10x10xf32> to vector<10xf32>
    %47 = vector.shape_cast %46 : vector<10xf32> to vector<10x1xf32>
    %48 = vector.broadcast %47 : vector<10x1xf32> to vector<10x10xf32>
    %49 = arith.subf %45, %48 : vector<10x10xf32>
    %50 = math.exp %49 : vector<10x10xf32>
    %cst_27 = arith.constant dense<0.000000e+00> : vector<10xf32>
    %51 = vector.multi_reduction <add>, %50, %cst_27 [1] : vector<10x10xf32> to vector<10xf32>
    %52 = vector.shape_cast %51 : vector<10xf32> to vector<10x1xf32>
    %53 = tpu.reciprocal %52 {approx = true} : vector<10x1xf32> -> vector<10x1xf32>
    %54 = vector.broadcast %53 : vector<10x1xf32> to vector<10x10xf32>
    %55 = arith.mulf %50, %54 : vector<10x10xf32>
    %56 = arith.truncf %55 : vector<10x10xf32> to vector<10x10xbf16>
    %cst_28 = arith.constant dense<0.000000e+00> : vector<10x16xf32>
    %57 = tpu.matmul %56, %43, %cst_28 {dimension_numbers = #tpu.dot_dimension_numbers<[1], [0], [0], [1], [0, 0, 1, 1], [], []>} : vector<10x10xbf16>, vector<10x16xbf16>, vector<10x16xf32> -> vector<10x16xf32>
    %58 = vector.extract_strided_slice %37 {offsets = [0, 16], sizes = [10, 16], strides = [1, 1]} : vector<10x96xf32> to vector<10x16xf32>
    %59 = arith.truncf %58 : vector<10x16xf32> to vector<10x16xbf16>
    %60 = vector.extract_strided_slice %37 {offsets = [0, 48], sizes = [10, 16], strides = [1, 1]} : vector<10x96xf32> to vector<10x16xf32>
    %61 = arith.truncf %60 : vector<10x16xf32> to vector<10x16xbf16>
    %62 = vector.extract_strided_slice %37 {offsets = [0, 80], sizes = [10, 16], strides = [1, 1]} : vector<10x96xf32> to vector<10x16xf32>
    %63 = arith.truncf %62 : vector<10x16xf32> to vector<10x16xbf16>
    %cst_29 = arith.constant dense<0.000000e+00> : vector<10x10xf32>
    %64 = tpu.matmul %59, %61, %cst_29 {dimension_numbers = #tpu.dot_dimension_numbers<[1], [1], [0], [0], [0, 0, 1, 0], [], []>} : vector<10x16xbf16>, vector<10x16xbf16>, vector<10x10xf32> -> vector<10x10xf32>
    %65 = arith.addf %64, %0 : vector<10x10xf32>
    %cst_30 = arith.constant dense<0xFF800000> : vector<10xf32>
    %66 = vector.multi_reduction <maximumf>, %65, %cst_30 [1] : vector<10x10xf32> to vector<10xf32>
    %67 = vector.shape_cast %66 : vector<10xf32> to vector<10x1xf32>
    %68 = vector.broadcast %67 : vector<10x1xf32> to vector<10x10xf32>
    %69 = arith.subf %65, %68 : vector<10x10xf32>
    %70 = math.exp %69 : vector<10x10xf32>
    %cst_31 = arith.constant dense<0.000000e+00> : vector<10xf32>
    %71 = vector.multi_reduction <add>, %70, %cst_31 [1] : vector<10x10xf32> to vector<10xf32>
    %72 = vector.shape_cast %71 : vector<10xf32> to vector<10x1xf32>
    %73 = tpu.reciprocal %72 {approx = true} : vector<10x1xf32> -> vector<10x1xf32>
    %74 = vector.broadcast %73 : vector<10x1xf32> to vector<10x10xf32>
    %75 = arith.mulf %70, %74 : vector<10x10xf32>
    %76 = arith.truncf %75 : vector<10x10xf32> to vector<10x10xbf16>
    %cst_32 = arith.constant dense<0.000000e+00> : vector<10x16xf32>
    %77 = tpu.matmul %76, %63, %cst_32 {dimension_numbers = #tpu.dot_dimension_numbers<[1], [0], [0], [1], [0, 0, 1, 1], [], []>} : vector<10x10xbf16>, vector<10x16xbf16>, vector<10x16xf32> -> vector<10x16xf32>
    %78 = tpu.concatenate %57, %77 in 1 : vector<10x16xf32>, vector<10x16xf32> -> vector<10x32xf32>
    %79 = arith.truncf %78 : vector<10x32xf32> to vector<10x32xbf16>
    %c0_33 = arith.constant 0 : index
    %c0_34 = arith.constant 0 : index
    %c0_35 = arith.constant 0 : index
    %80 = vector.load %arg9[%c0_33, %c0_34, %c0_35] : memref<2x32x32xbf16, #tpu.memory_space<vmem>>, vector<1x32x32xbf16>
    %81 = vector.shape_cast %80 : vector<1x32x32xbf16> to vector<32x32xbf16>
    %cst_36 = arith.constant dense<0.000000e+00> : vector<10x32xf32>
    %82 = tpu.matmul %79, %81, %cst_36 {dimension_numbers = #tpu.dot_dimension_numbers<[1], [0], [0], [1], [0, 0, 1, 1], [], []>} : vector<10x32xbf16>, vector<32x32xbf16>, vector<10x32xf32> -> vector<10x32xf32>
    %83 = arith.addf %5, %82 : vector<10x32xf32>
    %c0_37 = arith.constant 0 : index
    %c0_38 = arith.constant 0 : index
    %c0_39 = arith.constant 0 : index
    %84 = vector.load %arg10[%c0_37, %c0_38, %c0_39] : memref<2x1x32xf32, #tpu.memory_space<vmem>>, vector<1x1x32xf32>
    %85 = vector.shape_cast %84 : vector<1x1x32xf32> to vector<1x32xf32>
    %86 = vector.broadcast %85 : vector<1x32xf32> to vector<10x32xf32>
    %87 = arith.addf %83, %86 : vector<10x32xf32>
    %c0_40 = arith.constant 0 : index
    %c0_41 = arith.constant 0 : index
    %c0_42 = arith.constant 0 : index
    %88 = vector.load %arg11[%c0_40, %c0_41, %c0_42] : memref<2x1x32xf32, #tpu.memory_space<vmem>>, vector<1x1x32xf32>
    %89 = vector.shape_cast %88 : vector<1x1x32xf32> to vector<1x32xf32>
    %c0_43 = arith.constant 0 : index
    %c0_44 = arith.constant 0 : index
    %c0_45 = arith.constant 0 : index
    %90 = vector.load %arg12[%c0_43, %c0_44, %c0_45] : memref<2x1x32xf32, #tpu.memory_space<vmem>>, vector<1x1x32xf32>
    %91 = vector.shape_cast %90 : vector<1x1x32xf32> to vector<1x32xf32>
    %cst_46 = arith.constant dense<0.000000e+00> : vector<10xf32>
    %92 = vector.multi_reduction <add>, %87, %cst_46 [1] : vector<10x32xf32> to vector<10xf32>
    %93 = vector.shape_cast %92 : vector<10xf32> to vector<10x1xf32>
    %cst_47 = arith.constant 3.200000e+01 : f32
    %94 = vector.broadcast %cst_47 : f32 to vector<10x1xf32>
    %95 = arith.divf %93, %94 : vector<10x1xf32>
    %96 = vector.broadcast %95 : vector<10x1xf32> to vector<10x32xf32>
    %97 = arith.subf %87, %96 : vector<10x32xf32>
    %98 = arith.mulf %97, %97 : vector<10x32xf32>
    %cst_48 = arith.constant dense<0.000000e+00> : vector<10xf32>
    %99 = vector.multi_reduction <add>, %98, %cst_48 [1] : vector<10x32xf32> to vector<10xf32>
    %100 = vector.shape_cast %99 : vector<10xf32> to vector<10x1xf32>
    %cst_49 = arith.constant 3.200000e+01 : f32
    %101 = vector.broadcast %cst_49 : f32 to vector<10x1xf32>
    %102 = arith.divf %100, %101 : vector<10x1xf32>
    %cst_50 = arith.constant 9.99999997E-7 : f32
    %103 = vector.broadcast %cst_50 : f32 to vector<10x1xf32>
    %104 = arith.addf %102, %103 : vector<10x1xf32>
    %105 = math.rsqrt %104 : vector<10x1xf32>
    %106 = vector.broadcast %105 : vector<10x1xf32> to vector<10x32xf32>
    %107 = arith.mulf %97, %106 : vector<10x32xf32>
    %108 = vector.broadcast %89 : vector<1x32xf32> to vector<10x32xf32>
    %109 = arith.mulf %107, %108 : vector<10x32xf32>
    %110 = vector.broadcast %91 : vector<1x32xf32> to vector<10x32xf32>
    %111 = arith.addf %109, %110 : vector<10x32xf32>
    %112 = arith.truncf %111 : vector<10x32xf32> to vector<10x32xbf16>
    %c0_51 = arith.constant 0 : index
    %c0_52 = arith.constant 0 : index
    %c0_53 = arith.constant 0 : index
    %113 = vector.load %arg13[%c0_51, %c0_52, %c0_53] : memref<2x32x64xbf16, #tpu.memory_space<vmem>>, vector<1x32x64xbf16>
    %114 = vector.shape_cast %113 : vector<1x32x64xbf16> to vector<32x64xbf16>
    %cst_54 = arith.constant dense<0.000000e+00> : vector<10x64xf32>
    %115 = tpu.matmul %112, %114, %cst_54 {dimension_numbers = #tpu.dot_dimension_numbers<[1], [0], [0], [1], [0, 0, 1, 1], [], []>} : vector<10x32xbf16>, vector<32x64xbf16>, vector<10x64xf32> -> vector<10x64xf32>
    %c0_55 = arith.constant 0 : index
    %c0_56 = arith.constant 0 : index
    %c0_57 = arith.constant 0 : index
    %116 = vector.load %arg14[%c0_55, %c0_56, %c0_57] : memref<2x1x64xf32, #tpu.memory_space<vmem>>, vector<1x1x64xf32>
    %117 = vector.shape_cast %116 : vector<1x1x64xf32> to vector<1x64xf32>
    %118 = vector.broadcast %117 : vector<1x64xf32> to vector<10x64xf32>
    %119 = arith.addf %115, %118 : vector<10x64xf32>
    %cst_58 = arith.constant 5.000000e-01 : f32
    %120 = vector.broadcast %cst_58 : f32 to vector<10x64xf32>
    %121 = arith.mulf %120, %119 : vector<10x64xf32>
    %cst_59 = arith.constant 4.471500e-02 : f32
    %122 = vector.broadcast %cst_59 : f32 to vector<10x64xf32>
    %123 = arith.mulf %122, %119 : vector<10x64xf32>
    %124 = arith.mulf %123, %119 : vector<10x64xf32>
    %125 = arith.mulf %124, %119 : vector<10x64xf32>
    %126 = arith.addf %119, %125 : vector<10x64xf32>
    %cst_60 = arith.constant 0.797884583 : f32
    %127 = vector.broadcast %cst_60 : f32 to vector<10x64xf32>
    %128 = arith.mulf %127, %126 : vector<10x64xf32>
    %129 = math.tanh %128 : vector<10x64xf32>
    %cst_61 = arith.constant 1.000000e+00 : f32
    %130 = vector.broadcast %cst_61 : f32 to vector<10x64xf32>
    %131 = arith.addf %130, %129 : vector<10x64xf32>
    %132 = arith.mulf %121, %131 : vector<10x64xf32>
    %133 = arith.truncf %132 : vector<10x64xf32> to vector<10x64xbf16>
    %c0_62 = arith.constant 0 : index
    %c0_63 = arith.constant 0 : index
    %c0_64 = arith.constant 0 : index
    %134 = vector.load %arg15[%c0_62, %c0_63, %c0_64] : memref<2x64x32xbf16, #tpu.memory_space<vmem>>, vector<1x64x32xbf16>
    %135 = vector.shape_cast %134 : vector<1x64x32xbf16> to vector<64x32xbf16>
    %cst_65 = arith.constant dense<0.000000e+00> : vector<10x32xf32>
    %136 = tpu.matmul %133, %135, %cst_65 {dimension_numbers = #tpu.dot_dimension_numbers<[1], [0], [0], [1], [0, 0, 1, 1], [], []>} : vector<10x64xbf16>, vector<64x32xbf16>, vector<10x32xf32> -> vector<10x32xf32>
    %137 = arith.addf %87, %136 : vector<10x32xf32>
    %c0_66 = arith.constant 0 : index
    %c0_67 = arith.constant 0 : index
    %c0_68 = arith.constant 0 : index
    %138 = vector.load %arg16[%c0_66, %c0_67, %c0_68] : memref<2x1x32xf32, #tpu.memory_space<vmem>>, vector<1x1x32xf32>
    %139 = vector.shape_cast %138 : vector<1x1x32xf32> to vector<1x32xf32>
    %140 = vector.broadcast %139 : vector<1x32xf32> to vector<10x32xf32>
    %141 = arith.addf %137, %140 : vector<10x32xf32>
    %c1 = arith.constant 1 : index
    %c0_69 = arith.constant 0 : index
    %c0_70 = arith.constant 0 : index
    %142 = vector.load %arg5[%c1, %c0_69, %c0_70] : memref<2x1x32xf32, #tpu.memory_space<vmem>>, vector<1x1x32xf32>
    %143 = vector.shape_cast %142 : vector<1x1x32xf32> to vector<1x32xf32>
    %c1_71 = arith.constant 1 : index
    %c0_72 = arith.constant 0 : index
    %c0_73 = arith.constant 0 : index
    %144 = vector.load %arg6[%c1_71, %c0_72, %c0_73] : memref<2x1x32xf32, #tpu.memory_space<vmem>>, vector<1x1x32xf32>
    %145 = vector.shape_cast %144 : vector<1x1x32xf32> to vector<1x32xf32>
    %cst_74 = arith.constant dense<0.000000e+00> : vector<10xf32>
    %146 = vector.multi_reduction <add>, %141, %cst_74 [1] : vector<10x32xf32> to vector<10xf32>
    %147 = vector.shape_cast %146 : vector<10xf32> to vector<10x1xf32>
    %cst_75 = arith.constant 3.200000e+01 : f32
    %148 = vector.broadcast %cst_75 : f32 to vector<10x1xf32>
    %149 = arith.divf %147, %148 : vector<10x1xf32>
    %150 = vector.broadcast %149 : vector<10x1xf32> to vector<10x32xf32>
    %151 = arith.subf %141, %150 : vector<10x32xf32>
    %152 = arith.mulf %151, %151 : vector<10x32xf32>
    %cst_76 = arith.constant dense<0.000000e+00> : vector<10xf32>
    %153 = vector.multi_reduction <add>, %152, %cst_76 [1] : vector<10x32xf32> to vector<10xf32>
    %154 = vector.shape_cast %153 : vector<10xf32> to vector<10x1xf32>
    %cst_77 = arith.constant 3.200000e+01 : f32
    %155 = vector.broadcast %cst_77 : f32 to vector<10x1xf32>
    %156 = arith.divf %154, %155 : vector<10x1xf32>
    %cst_78 = arith.constant 9.99999997E-7 : f32
    %157 = vector.broadcast %cst_78 : f32 to vector<10x1xf32>
    %158 = arith.addf %156, %157 : vector<10x1xf32>
    %159 = math.rsqrt %158 : vector<10x1xf32>
    %160 = vector.broadcast %159 : vector<10x1xf32> to vector<10x32xf32>
    %161 = arith.mulf %151, %160 : vector<10x32xf32>
    %162 = vector.broadcast %143 : vector<1x32xf32> to vector<10x32xf32>
    %163 = arith.mulf %161, %162 : vector<10x32xf32>
    %164 = vector.broadcast %145 : vector<1x32xf32> to vector<10x32xf32>
    %165 = arith.addf %163, %164 : vector<10x32xf32>
    %166 = arith.truncf %165 : vector<10x32xf32> to vector<10x32xbf16>
    %c1_79 = arith.constant 1 : index
    %c0_80 = arith.constant 0 : index
    %c0_81 = arith.constant 0 : index
    %167 = vector.load %arg7[%c1_79, %c0_80, %c0_81] : memref<2x32x96xbf16, #tpu.memory_space<vmem>>, vector<1x32x96xbf16>
    %168 = vector.shape_cast %167 : vector<1x32x96xbf16> to vector<32x96xbf16>
    %cst_82 = arith.constant dense<0.000000e+00> : vector<10x96xf32>
    %169 = tpu.matmul %166, %168, %cst_82 {dimension_numbers = #tpu.dot_dimension_numbers<[1], [0], [0], [1], [0, 0, 1, 1], [], []>} : vector<10x32xbf16>, vector<32x96xbf16>, vector<10x96xf32> -> vector<10x96xf32>
    %c1_83 = arith.constant 1 : index
    %c0_84 = arith.constant 0 : index
    %c0_85 = arith.constant 0 : index
    %170 = vector.load %arg8[%c1_83, %c0_84, %c0_85] : memref<2x1x96xf32, #tpu.memory_space<vmem>>, vector<1x1x96xf32>
    %171 = vector.shape_cast %170 : vector<1x1x96xf32> to vector<1x96xf32>
    %172 = vector.broadcast %171 : vector<1x96xf32> to vector<10x96xf32>
    %173 = arith.addf %169, %172 : vector<10x96xf32>
    %174 = vector.extract_strided_slice %173 {offsets = [0, 0], sizes = [10, 16], strides = [1, 1]} : vector<10x96xf32> to vector<10x16xf32>
    %175 = arith.truncf %174 : vector<10x16xf32> to vector<10x16xbf16>
    %176 = vector.extract_strided_slice %173 {offsets = [0, 32], sizes = [10, 16], strides = [1, 1]} : vector<10x96xf32> to vector<10x16xf32>
    %177 = arith.truncf %176 : vector<10x16xf32> to vector<10x16xbf16>
    %178 = vector.extract_strided_slice %173 {offsets = [0, 64], sizes = [10, 16], strides = [1, 1]} : vector<10x96xf32> to vector<10x16xf32>
    %179 = arith.truncf %178 : vector<10x16xf32> to vector<10x16xbf16>
    %cst_86 = arith.constant dense<0.000000e+00> : vector<10x10xf32>
    %180 = tpu.matmul %175, %177, %cst_86 {dimension_numbers = #tpu.dot_dimension_numbers<[1], [1], [0], [0], [0, 0, 1, 0], [], []>} : vector<10x16xbf16>, vector<10x16xbf16>, vector<10x10xf32> -> vector<10x10xf32>
    %181 = arith.addf %180, %0 : vector<10x10xf32>
    %cst_87 = arith.constant dense<0xFF800000> : vector<10xf32>
    %182 = vector.multi_reduction <maximumf>, %181, %cst_87 [1] : vector<10x10xf32> to vector<10xf32>
    %183 = vector.shape_cast %182 : vector<10xf32> to vector<10x1xf32>
    %184 = vector.broadcast %183 : vector<10x1xf32> to vector<10x10xf32>
    %185 = arith.subf %181, %184 : vector<10x10xf32>
    %186 = math.exp %185 : vector<10x10xf32>
    %cst_88 = arith.constant dense<0.000000e+00> : vector<10xf32>
    %187 = vector.multi_reduction <add>, %186, %cst_88 [1] : vector<10x10xf32> to vector<10xf32>
    %188 = vector.shape_cast %187 : vector<10xf32> to vector<10x1xf32>
    %189 = tpu.reciprocal %188 {approx = true} : vector<10x1xf32> -> vector<10x1xf32>
    %190 = vector.broadcast %189 : vector<10x1xf32> to vector<10x10xf32>
    %191 = arith.mulf %186, %190 : vector<10x10xf32>
    %192 = arith.truncf %191 : vector<10x10xf32> to vector<10x10xbf16>
    %cst_89 = arith.constant dense<0.000000e+00> : vector<10x16xf32>
    %193 = tpu.matmul %192, %179, %cst_89 {dimension_numbers = #tpu.dot_dimension_numbers<[1], [0], [0], [1], [0, 0, 1, 1], [], []>} : vector<10x10xbf16>, vector<10x16xbf16>, vector<10x16xf32> -> vector<10x16xf32>
    %194 = vector.extract_strided_slice %173 {offsets = [0, 16], sizes = [10, 16], strides = [1, 1]} : vector<10x96xf32> to vector<10x16xf32>
    %195 = arith.truncf %194 : vector<10x16xf32> to vector<10x16xbf16>
    %196 = vector.extract_strided_slice %173 {offsets = [0, 48], sizes = [10, 16], strides = [1, 1]} : vector<10x96xf32> to vector<10x16xf32>
    %197 = arith.truncf %196 : vector<10x16xf32> to vector<10x16xbf16>
    %198 = vector.extract_strided_slice %173 {offsets = [0, 80], sizes = [10, 16], strides = [1, 1]} : vector<10x96xf32> to vector<10x16xf32>
    %199 = arith.truncf %198 : vector<10x16xf32> to vector<10x16xbf16>
    %cst_90 = arith.constant dense<0.000000e+00> : vector<10x10xf32>
    %200 = tpu.matmul %195, %197, %cst_90 {dimension_numbers = #tpu.dot_dimension_numbers<[1], [1], [0], [0], [0, 0, 1, 0], [], []>} : vector<10x16xbf16>, vector<10x16xbf16>, vector<10x10xf32> -> vector<10x10xf32>
    %201 = arith.addf %200, %0 : vector<10x10xf32>
    %cst_91 = arith.constant dense<0xFF800000> : vector<10xf32>
    %202 = vector.multi_reduction <maximumf>, %201, %cst_91 [1] : vector<10x10xf32> to vector<10xf32>
    %203 = vector.shape_cast %202 : vector<10xf32> to vector<10x1xf32>
    %204 = vector.broadcast %203 : vector<10x1xf32> to vector<10x10xf32>
    %205 = arith.subf %201, %204 : vector<10x10xf32>
    %206 = math.exp %205 : vector<10x10xf32>
    %cst_92 = arith.constant dense<0.000000e+00> : vector<10xf32>
    %207 = vector.multi_reduction <add>, %206, %cst_92 [1] : vector<10x10xf32> to vector<10xf32>
    %208 = vector.shape_cast %207 : vector<10xf32> to vector<10x1xf32>
    %209 = tpu.reciprocal %208 {approx = true} : vector<10x1xf32> -> vector<10x1xf32>
    %210 = vector.broadcast %209 : vector<10x1xf32> to vector<10x10xf32>
    %211 = arith.mulf %206, %210 : vector<10x10xf32>
    %212 = arith.truncf %211 : vector<10x10xf32> to vector<10x10xbf16>
    %cst_93 = arith.constant dense<0.000000e+00> : vector<10x16xf32>
    %213 = tpu.matmul %212, %199, %cst_93 {dimension_numbers = #tpu.dot_dimension_numbers<[1], [0], [0], [1], [0, 0, 1, 1], [], []>} : vector<10x10xbf16>, vector<10x16xbf16>, vector<10x16xf32> -> vector<10x16xf32>
    %214 = tpu.concatenate %193, %213 in 1 : vector<10x16xf32>, vector<10x16xf32> -> vector<10x32xf32>
    %215 = arith.truncf %214 : vector<10x32xf32> to vector<10x32xbf16>
    %c1_94 = arith.constant 1 : index
    %c0_95 = arith.constant 0 : index
    %c0_96 = arith.constant 0 : index
    %216 = vector.load %arg9[%c1_94, %c0_95, %c0_96] : memref<2x32x32xbf16, #tpu.memory_space<vmem>>, vector<1x32x32xbf16>
    %217 = vector.shape_cast %216 : vector<1x32x32xbf16> to vector<32x32xbf16>
    %cst_97 = arith.constant dense<0.000000e+00> : vector<10x32xf32>
    %218 = tpu.matmul %215, %217, %cst_97 {dimension_numbers = #tpu.dot_dimension_numbers<[1], [0], [0], [1], [0, 0, 1, 1], [], []>} : vector<10x32xbf16>, vector<32x32xbf16>, vector<10x32xf32> -> vector<10x32xf32>
    %219 = arith.addf %141, %218 : vector<10x32xf32>
    %c1_98 = arith.constant 1 : index
    %c0_99 = arith.constant 0 : index
    %c0_100 = arith.constant 0 : index
    %220 = vector.load %arg10[%c1_98, %c0_99, %c0_100] : memref<2x1x32xf32, #tpu.memory_space<vmem>>, vector<1x1x32xf32>
    %221 = vector.shape_cast %220 : vector<1x1x32xf32> to vector<1x32xf32>
    %222 = vector.broadcast %221 : vector<1x32xf32> to vector<10x32xf32>
    %223 = arith.addf %219, %222 : vector<10x32xf32>
    %c1_101 = arith.constant 1 : index
    %c0_102 = arith.constant 0 : index
    %c0_103 = arith.constant 0 : index
    %224 = vector.load %arg11[%c1_101, %c0_102, %c0_103] : memref<2x1x32xf32, #tpu.memory_space<vmem>>, vector<1x1x32xf32>
    %225 = vector.shape_cast %224 : vector<1x1x32xf32> to vector<1x32xf32>
    %c1_104 = arith.constant 1 : index
    %c0_105 = arith.constant 0 : index
    %c0_106 = arith.constant 0 : index
    %226 = vector.load %arg12[%c1_104, %c0_105, %c0_106] : memref<2x1x32xf32, #tpu.memory_space<vmem>>, vector<1x1x32xf32>
    %227 = vector.shape_cast %226 : vector<1x1x32xf32> to vector<1x32xf32>
    %cst_107 = arith.constant dense<0.000000e+00> : vector<10xf32>
    %228 = vector.multi_reduction <add>, %223, %cst_107 [1] : vector<10x32xf32> to vector<10xf32>
    %229 = vector.shape_cast %228 : vector<10xf32> to vector<10x1xf32>
    %cst_108 = arith.constant 3.200000e+01 : f32
    %230 = vector.broadcast %cst_108 : f32 to vector<10x1xf32>
    %231 = arith.divf %229, %230 : vector<10x1xf32>
    %232 = vector.broadcast %231 : vector<10x1xf32> to vector<10x32xf32>
    %233 = arith.subf %223, %232 : vector<10x32xf32>
    %234 = arith.mulf %233, %233 : vector<10x32xf32>
    %cst_109 = arith.constant dense<0.000000e+00> : vector<10xf32>
    %235 = vector.multi_reduction <add>, %234, %cst_109 [1] : vector<10x32xf32> to vector<10xf32>
    %236 = vector.shape_cast %235 : vector<10xf32> to vector<10x1xf32>
    %cst_110 = arith.constant 3.200000e+01 : f32
    %237 = vector.broadcast %cst_110 : f32 to vector<10x1xf32>
    %238 = arith.divf %236, %237 : vector<10x1xf32>
    %cst_111 = arith.constant 9.99999997E-7 : f32
    %239 = vector.broadcast %cst_111 : f32 to vector<10x1xf32>
    %240 = arith.addf %238, %239 : vector<10x1xf32>
    %241 = math.rsqrt %240 : vector<10x1xf32>
    %242 = vector.broadcast %241 : vector<10x1xf32> to vector<10x32xf32>
    %243 = arith.mulf %233, %242 : vector<10x32xf32>
    %244 = vector.broadcast %225 : vector<1x32xf32> to vector<10x32xf32>
    %245 = arith.mulf %243, %244 : vector<10x32xf32>
    %246 = vector.broadcast %227 : vector<1x32xf32> to vector<10x32xf32>
    %247 = arith.addf %245, %246 : vector<10x32xf32>
    %248 = arith.truncf %247 : vector<10x32xf32> to vector<10x32xbf16>
    %c1_112 = arith.constant 1 : index
    %c0_113 = arith.constant 0 : index
    %c0_114 = arith.constant 0 : index
    %249 = vector.load %arg13[%c1_112, %c0_113, %c0_114] : memref<2x32x64xbf16, #tpu.memory_space<vmem>>, vector<1x32x64xbf16>
    %250 = vector.shape_cast %249 : vector<1x32x64xbf16> to vector<32x64xbf16>
    %cst_115 = arith.constant dense<0.000000e+00> : vector<10x64xf32>
    %251 = tpu.matmul %248, %250, %cst_115 {dimension_numbers = #tpu.dot_dimension_numbers<[1], [0], [0], [1], [0, 0, 1, 1], [], []>} : vector<10x32xbf16>, vector<32x64xbf16>, vector<10x64xf32> -> vector<10x64xf32>
    %c1_116 = arith.constant 1 : index
    %c0_117 = arith.constant 0 : index
    %c0_118 = arith.constant 0 : index
    %252 = vector.load %arg14[%c1_116, %c0_117, %c0_118] : memref<2x1x64xf32, #tpu.memory_space<vmem>>, vector<1x1x64xf32>
    %253 = vector.shape_cast %252 : vector<1x1x64xf32> to vector<1x64xf32>
    %254 = vector.broadcast %253 : vector<1x64xf32> to vector<10x64xf32>
    %255 = arith.addf %251, %254 : vector<10x64xf32>
    %cst_119 = arith.constant 5.000000e-01 : f32
    %256 = vector.broadcast %cst_119 : f32 to vector<10x64xf32>
    %257 = arith.mulf %256, %255 : vector<10x64xf32>
    %cst_120 = arith.constant 4.471500e-02 : f32
    %258 = vector.broadcast %cst_120 : f32 to vector<10x64xf32>
    %259 = arith.mulf %258, %255 : vector<10x64xf32>
    %260 = arith.mulf %259, %255 : vector<10x64xf32>
    %261 = arith.mulf %260, %255 : vector<10x64xf32>
    %262 = arith.addf %255, %261 : vector<10x64xf32>
    %cst_121 = arith.constant 0.797884583 : f32
    %263 = vector.broadcast %cst_121 : f32 to vector<10x64xf32>
    %264 = arith.mulf %263, %262 : vector<10x64xf32>
    %265 = math.tanh %264 : vector<10x64xf32>
    %cst_122 = arith.constant 1.000000e+00 : f32
    %266 = vector.broadcast %cst_122 : f32 to vector<10x64xf32>
    %267 = arith.addf %266, %265 : vector<10x64xf32>
    %268 = arith.mulf %257, %267 : vector<10x64xf32>
    %269 = arith.truncf %268 : vector<10x64xf32> to vector<10x64xbf16>
    %c1_123 = arith.constant 1 : index
    %c0_124 = arith.constant 0 : index
    %c0_125 = arith.constant 0 : index
    %270 = vector.load %arg15[%c1_123, %c0_124, %c0_125] : memref<2x64x32xbf16, #tpu.memory_space<vmem>>, vector<1x64x32xbf16>
    %271 = vector.shape_cast %270 : vector<1x64x32xbf16> to vector<64x32xbf16>
    %cst_126 = arith.constant dense<0.000000e+00> : vector<10x32xf32>
    %272 = tpu.matmul %269, %271, %cst_126 {dimension_numbers = #tpu.dot_dimension_numbers<[1], [0], [0], [1], [0, 0, 1, 1], [], []>} : vector<10x64xbf16>, vector<64x32xbf16>, vector<10x32xf32> -> vector<10x32xf32>
    %273 = arith.addf %223, %272 : vector<10x32xf32>
    %c1_127 = arith.constant 1 : index
    %c0_128 = arith.constant 0 : index
    %c0_129 = arith.constant 0 : index
    %274 = vector.load %arg16[%c1_127, %c0_128, %c0_129] : memref<2x1x32xf32, #tpu.memory_space<vmem>>, vector<1x1x32xf32>
    %275 = vector.shape_cast %274 : vector<1x1x32xf32> to vector<1x32xf32>
    %276 = vector.broadcast %275 : vector<1x32xf32> to vector<10x32xf32>
    %277 = arith.addf %273, %276 : vector<10x32xf32>
    %c0_130 = arith.constant 0 : index
    %c0_131 = arith.constant 0 : index
    %278 = vector.load %arg17[%c0_130, %c0_131] : memref<1x32xf32, #tpu.memory_space<vmem>>, vector<1x32xf32>
    %c0_132 = arith.constant 0 : index
    %c0_133 = arith.constant 0 : index
    %279 = vector.load %arg18[%c0_132, %c0_133] : memref<1x32xf32, #tpu.memory_space<vmem>>, vector<1x32xf32>
    %cst_134 = arith.constant dense<0.000000e+00> : vector<10xf32>
    %280 = vector.multi_reduction <add>, %277, %cst_134 [1] : vector<10x32xf32> to vector<10xf32>
    %281 = vector.shape_cast %280 : vector<10xf32> to vector<10x1xf32>
    %cst_135 = arith.constant 3.200000e+01 : f32
    %282 = vector.broadcast %cst_135 : f32 to vector<10x1xf32>
    %283 = arith.divf %281, %282 : vector<10x1xf32>
    %284 = vector.broadcast %283 : vector<10x1xf32> to vector<10x32xf32>
    %285 = arith.subf %277, %284 : vector<10x32xf32>
    %286 = arith.mulf %285, %285 : vector<10x32xf32>
    %cst_136 = arith.constant dense<0.000000e+00> : vector<10xf32>
    %287 = vector.multi_reduction <add>, %286, %cst_136 [1] : vector<10x32xf32> to vector<10xf32>
    %288 = vector.shape_cast %287 : vector<10xf32> to vector<10x1xf32>
    %cst_137 = arith.constant 3.200000e+01 : f32
    %289 = vector.broadcast %cst_137 : f32 to vector<10x1xf32>
    %290 = arith.divf %288, %289 : vector<10x1xf32>
    %cst_138 = arith.constant 9.99999997E-7 : f32
    %291 = vector.broadcast %cst_138 : f32 to vector<10x1xf32>
    %292 = arith.addf %290, %291 : vector<10x1xf32>
    %293 = math.rsqrt %292 : vector<10x1xf32>
    %294 = vector.broadcast %293 : vector<10x1xf32> to vector<10x32xf32>
    %295 = arith.mulf %285, %294 : vector<10x32xf32>
    %296 = vector.broadcast %278 : vector<1x32xf32> to vector<10x32xf32>
    %297 = arith.mulf %295, %296 : vector<10x32xf32>
    %298 = vector.broadcast %279 : vector<1x32xf32> to vector<10x32xf32>
    %299 = arith.addf %297, %298 : vector<10x32xf32>
    %300 = arith.truncf %299 : vector<10x32xf32> to vector<10x32xbf16>
    %c0_139 = arith.constant 0 : index
    %c0_140 = arith.constant 0 : index
    %301 = vector.load %arg19[%c0_139, %c0_140] : memref<32x128xbf16, #tpu.memory_space<vmem>>, vector<32x128xbf16>
    %cst_141 = arith.constant dense<0.000000e+00> : vector<10x128xf32>
    %302 = tpu.matmul %300, %301, %cst_141 {dimension_numbers = #tpu.dot_dimension_numbers<[1], [0], [0], [1], [0, 0, 1, 1], [], []>} : vector<10x32xbf16>, vector<32x128xbf16>, vector<10x128xf32> -> vector<10x128xf32>
    %c0_142 = arith.constant 0 : index
    %c0_143 = arith.constant 0 : index
    %303 = vector.load %arg20[%c0_142, %c0_143] : memref<1x128xf32, #tpu.memory_space<vmem>>, vector<1x128xf32>
    %304 = vector.broadcast %303 : vector<1x128xf32> to vector<10x128xf32>
    %305 = arith.addf %302, %304 : vector<10x128xf32>
    %c0_144 = arith.constant 0 : index
    %c0_145 = arith.constant 0 : index
    %306 = vector.load %arg21[%c0_144, %c0_145] : memref<10x128xf32, #tpu.memory_space<vmem>>, vector<10x128xf32>
    tpu.vector_store %arg21[%c0_144, %c0_145], %305 {strides = array<i32>} : memref<10x128xf32, #tpu.memory_space<vmem>>, vector<10x128xf32>,
    return
  }
  func.func @transform_0(%arg0: i32) -> (i32, i32) {
    %c0_i32 = arith.constant 0 : i32
    %c0_i32_0 = arith.constant 0 : i32
    return %arg0, %c0_i32 : i32, i32
  }
  func.func @transform_1(%arg0: i32) -> (i32, i32) {
    %c0_i32 = arith.constant 0 : i32
    %c0_i32_0 = arith.constant 0 : i32
    %c0_i32_1 = arith.constant 0 : i32
    return %c0_i32, %c0_i32_0 : i32, i32
  }
  func.func @transform_2(%arg0: i32) -> (i32, i32) {
    %c0_i32 = arith.constant 0 : i32
    %c0_i32_0 = arith.constant 0 : i32
    %c0_i32_1 = arith.constant 0 : i32
    return %c0_i32, %c0_i32_0 : i32, i32
  }
  func.func @transform_3(%arg0: i32) -> (i32, i32) {
    %c0_i32 = arith.constant 0 : i32
    %c0_i32_0 = arith.constant 0 : i32
    %c0_i32_1 = arith.constant 0 : i32
    return %c0_i32, %c0_i32_0 : i32, i32
  }
  func.func @transform_4(%arg0: i32) -> (i32, i32, i32) {
    %c0_i32 = arith.constant 0 : i32
    %c0_i32_0 = arith.constant 0 : i32
    %c0_i32_1 = arith.constant 0 : i32
    %c0_i32_2 = arith.constant 0 : i32
    return %c0_i32, %c0_i32_0, %c0_i32_1 : i32, i32, i32
  }
  func.func @transform_5(%arg0: i32) -> (i32, i32, i32) {
    %c0_i32 = arith.constant 0 : i32
    %c0_i32_0 = arith.constant 0 : i32
    %c0_i32_1 = arith.constant 0 : i32
    %c0_i32_2 = arith.constant 0 : i32
    return %c0_i32, %c0_i32_0, %c0_i32_1 : i32, i32, i32
  }
  func.func @transform_6(%arg0: i32) -> (i32, i32, i32) {
    %c0_i32 = arith.constant 0 : i32
    %c0_i32_0 = arith.constant 0 : i32
    %c0_i32_1 = arith.constant 0 : i32
    %c0_i32_2 = arith.constant 0 : i32
    return %c0_i32, %c0_i32_0, %c0_i32_1 : i32, i32, i32
  }
  func.func @transform_7(%arg0: i32) -> (i32, i32, i32) {
    %c0_i32 = arith.constant 0 : i32
    %c0_i32_0 = arith.constant 0 : i32
    %c0_i32_1 = arith.constant 0 : i32
    %c0_i32_2 = arith.constant 0 : i32
    return %c0_i32, %c0_i32_0, %c0_i32_1 : i32, i32, i32
  }
  func.func @transform_8(%arg0: i32) -> (i32, i32, i32) {
    %c0_i32 = arith.constant 0 : i32
    %c0_i32_0 = arith.constant 0 : i32
    %c0_i32_1 = arith.constant 0 : i32
    %c0_i32_2 = arith.constant 0 : i32
    return %c0_i32, %c0_i32_0, %c0_i32_1 : i32, i32, i32
  }
  func.func @transform_9(%arg0: i32) -> (i32, i32, i32) {
    %c0_i32 = arith.constant 0 : i32
    %c0_i32_0 = arith.constant 0 : i32
    %c0_i32_1 = arith.constant 0 : i32
    %c0_i32_2 = arith.constant 0 : i32
    return %c0_i32, %c0_i32_0, %c0_i32_1 : i32, i32, i32
  }
  func.func @transform_10(%arg0: i32) -> (i32, i32, i32) {
    %c0_i32 = arith.constant 0 : i32
    %c0_i32_0 = arith.constant 0 : i32
    %c0_i32_1 = arith.constant 0 : i32
    %c0_i32_2 = arith.constant 0 : i32
    return %c0_i32, %c0_i32_0, %c0_i32_1 : i32, i32, i32
  }
  func.func @transform_11(%arg0: i32) -> (i32, i32, i32) {
    %c0_i32 = arith.constant 0 : i32
    %c0_i32_0 = arith.constant 0 : i32
    %c0_i32_1 = arith.constant 0 : i32
    %c0_i32_2 = arith.constant 0 : i32
    return %c0_i32, %c0_i32_0, %c0_i32_1 : i32, i32, i32
  }
  func.func @transform_12(%arg0: i32) -> (i32, i32, i32) {
    %c0_i32 = arith.constant 0 : i32
    %c0_i32_0 = arith.constant 0 : i32
    %c0_i32_1 = arith.constant 0 : i32
    %c0_i32_2 = arith.constant 0 : i32
    return %c0_i32, %c0_i32_0, %c0_i32_1 : i32, i32, i32
  }
  func.func @transform_13(%arg0: i32) -> (i32, i32, i32) {
    %c0_i32 = arith.constant 0 : i32
    %c0_i32_0 = arith.constant 0 : i32
    %c0_i32_1 = arith.constant 0 : i32
    %c0_i32_2 = arith.constant 0 : i32
    return %c0_i32, %c0_i32_0, %c0_i32_1 : i32, i32, i32
  }
  func.func @transform_14(%arg0: i32) -> (i32, i32, i32) {
    %c0_i32 = arith.constant 0 : i32
    %c0_i32_0 = arith.constant 0 : i32
    %c0_i32_1 = arith.constant 0 : i32
    %c0_i32_2 = arith.constant 0 : i32
    return %c0_i32, %c0_i32_0, %c0_i32_1 : i32, i32, i32
  }
  func.func @transform_15(%arg0: i32) -> (i32, i32, i32) {
    %c0_i32 = arith.constant 0 : i32
    %c0_i32_0 = arith.constant 0 : i32
    %c0_i32_1 = arith.constant 0 : i32
    %c0_i32_2 = arith.constant 0 : i32
    return %c0_i32, %c0_i32_0, %c0_i32_1 : i32, i32, i32
  }
  func.func @transform_16(%arg0: i32) -> (i32, i32) {
    %c0_i32 = arith.constant 0 : i32
    %c0_i32_0 = arith.constant 0 : i32
    %c0_i32_1 = arith.constant 0 : i32
    return %c0_i32, %c0_i32_0 : i32, i32
  }
  func.func @transform_17(%arg0: i32) -> (i32, i32) {
    %c0_i32 = arith.constant 0 : i32
    %c0_i32_0 = arith.constant 0 : i32
    %c0_i32_1 = arith.constant 0 : i32
    return %c0_i32, %c0_i32_0 : i32, i32
  }
  func.func @transform_18(%arg0: i32) -> (i32, i32) {
    %c0_i32 = arith.constant 0 : i32
    %c0_i32_0 = arith.constant 0 : i32
    %c0_i32_1 = arith.constant 0 : i32
    return %c0_i32, %c0_i32_0 : i32, i32
  }
  func.func @transform_19(%arg0: i32) -> (i32, i32) {
    %c0_i32 = arith.constant 0 : i32
    %c0_i32_0 = arith.constant 0 : i32
    %c0_i32_1 = arith.constant 0 : i32
    return %c0_i32, %c0_i32_0 : i32, i32
  }
  func.func @transform_20(%arg0: i32) -> (i32, i32) {
    %c0_i32 = arith.constant 0 : i32
    %c0_i32_0 = arith.constant 0 : i32
    return %arg0, %c0_i32 : i32, i32
  }
}

</mosaic_0001>

<bundles_post_ra>
// kernel: tpu_custom_call.1
= control target key start
LH: loop header
LB: loop body
LE: loop exit
PB: predicated region body
PF: predicated region fallthrough
CT: control target
= control target key end

     0   :  { %s3185_s0 = inlined_call_operand.vmem [shape: bf16[10,640], index: 0, kind: input, shape index: {}]   ;;  %s3186_s1 = inlined_call_operand.vmem [shape: f32[10,10], index: 1, kind: input, shape index: {}]   ;;  %s3187_s2 = inlined_call_operand.vmem [shape: f32[10,32], index: 2, kind: input, shape index: {}]   ;;  %s3188_s3 = inlined_call_operand.vmem [shape: bf16[640,32], index: 3, kind: input, shape index: {}]   ;;  %s3189_s4 = inlined_call_operand.vmem [shape: f32[2,1,32], index: 4, kind: input, shape index: {}]   ;;  %s3190_s5 = inlined_call_operand.vmem [shape: f32[2,1,32], index: 5, kind: input, shape index: {}]   ;;  %s3191_s6 = inlined_call_operand.vmem [shape: bf16[2,32,96], index: 6, kind: input, shape index: {}]   ;;  %s3192_s7 = inlined_call_operand.vmem [shape: f32[2,1,96], index: 7, kind: input, shape index: {}]   ;;  %s3193_s8 = inlined_call_operand.vmem [shape: bf16[2,32,32], index: 8, kind: input, shape index: {}]   ;;  %s3194_s9 = inlined_call_operand.vmem [shape: f32[2,1,32], index: 9, kind: input, shape index: {}]   ;;  %s3195_s10 = inlined_call_operand.vmem [shape: f32[2,1,32], index: 10, kind: input, shape index: {}]   ;;  %s3196_s11 = inlined_call_operand.vmem [shape: f32[2,1,32], index: 11, kind: input, shape index: {}]   ;;  %s3197_s12 = inlined_call_operand.vmem [shape: bf16[2,32,64], index: 12, kind: input, shape index: {}]   ;;  %s3198_s13 = inlined_call_operand.vmem [shape: f32[2,1,64], index: 13, kind: input, shape index: {}]   ;;  %s3199_s14 = inlined_call_operand.vmem [shape: bf16[2,64,32], index: 14, kind: input, shape index: {}]   ;;  %s3200_s15 = inlined_call_operand.vmem [shape: f32[2,1,32], index: 15, kind: input, shape index: {}]   ;;  %s3201_s16 = inlined_call_operand.vmem [shape: f32[1,32], index: 16, kind: input, shape index: {}]   ;;  %s3202_s17 = inlined_call_operand.vmem [shape: f32[1,32], index: 17, kind: input, shape index: {}]   ;;  %s3203_s18 = inlined_call_operand.vmem [shape: bf16[32,128], index: 18, kind: input, shape index: {}]   ;;  %s3204_s19 = inlined_call_operand.vmem [shape: f32[1,128], index: 19, kind: input, shape index: {}]   ;;  %s3205_s20 = inlined_call_operand.hbm [shape: f32[10,128], index: 20, kind: output, shape index: {}]  }
   0x1   :  { %3211 = sst [smem:[#allocation5_spill]] %s3185_s0 }
   0x2   :  { %3212 = sst [smem:[#allocation6_spill]] %s3186_s1 }
   0x3   :  { %3213 = sst [smem:[#allocation7_spill]] %s3187_s2 }
   0x4   :  { %3214 = sst [smem:[#allocation8_spill]] %s3188_s3 }
   0x5   :  { %3215 = sst [smem:[#allocation9_spill]] %s3189_s4 }
   0x6   :  { %s3216_s23 = sld [smem:[#allocation8_spill]]  ;;  %s3217_s28 = sld [smem:[#allocation5_spill]]  ;;  %v2565_v34 = vmov 0.0   ;;  %vm2566_vm0 = vmmov 0  }
   0xc   :  { %v2412_v0 = vld [vmem:[%s3216_s23 + $0x40] sm:$0xff]   ;;  %v2416_v4 = vld [vmem:[%s3216_s23 + $0x48] sm:$0xff]   ;;  %v2420_v8 = vld [vmem:[%s3216_s23 + $0x50] sm:$0xff]  }
   0xd   :  { %v2413_v1 = vld [vmem:[%s3216_s23] sm:$0xff]   ;;  %2143 = vmatprep.subr.bf16.mxu0 %v2412_v0  ;;  %v2417_v5 = vld [vmem:[%s3216_s23 + $0x8] sm:$0xff]   ;;  %v2421_v9 = vld [vmem:[%s3216_s23 + $0x10] sm:$0xff]  }
   0xe   :  { %v2414_v2 = vld [vmem:[%s3216_s23 + $0xc0] sm:$0xff]   ;;  %2144 = vmatpush3.bf16.msra.mxu0 %v2413_v1  ;;  %v2418_v6 = vld [vmem:[%s3216_s23 + $0xc8] sm:$0xff]   ;;  %v2422_v10 = vld [vmem:[%s3216_s23 + $0xd0] sm:$0xff]  }
   0xf   :  { %v2415_v3 = vld [vmem:[%s3216_s23 + $0x80] sm:$0xff]   ;;  %2165 = vmatprep.subr.bf16.mxu1 %v2414_v2  ;;  %2145 = vmatprep.subr.bf16.mxu0 %v2416_v4  ;;  %v2419_v7 = vld [vmem:[%s3216_s23 + $0x88] sm:$0xff]   ;;  %v2423_v11 = vld [vmem:[%s3216_s23 + $0x90] sm:$0xff]  }
  0x10   :  { %2166 = vmatpush3.bf16.msra.mxu1 %v2415_v3  ;;  %v2424_v12 = vld [vmem:[%s3216_s23 + $0x58] sm:$0xff]   ;;  %v2428_v16 = vld [vmem:[%s3216_s23 + $0x60] sm:$0xff]   ;;  %v2432_v20 = vld [vmem:[%s3216_s23 + $0x68] sm:$0xff]  }
  0x11   :  { %2167 = vmatprep.subr.bf16.mxu1 %v2418_v6  ;;  %v2425_v13 = vld [vmem:[%s3216_s23 + $0x18] sm:$0xff]   ;;  %v2429_v17 = vld [vmem:[%s3216_s23 + $0x20] sm:$0xff]   ;;  %v2433_v21 = vld [vmem:[%s3216_s23 + $0x28] sm:$0xff]  }
  0x12   :  { %2146 = vmatpush3.bf16.msra.mxu0 %v2417_v5  ;;  %v2426_v14 = vld [vmem:[%s3216_s23 + $0xd8] sm:$0xff]   ;;  %v2430_v18 = vld [vmem:[%s3216_s23 + $0xe0] sm:$0xff]   ;;  %v2434_v22 = vld [vmem:[%s3216_s23 + $0xe8] sm:$0xff]  }
  0x13   :  { %2147 = vmatprep.subr.bf16.mxu0 %v2420_v8  ;;  %v2427_v15 = vld [vmem:[%s3216_s23 + $0x98] sm:$0xff]   ;;  %v2431_v19 = vld [vmem:[%s3216_s23 + $0xa0] sm:$0xff]   ;;  %v2435_v23 = vld [vmem:[%s3216_s23 + $0xa8] sm:$0xff]  }
  0x14   :  { %2168 = vmatpush3.bf16.msra.mxu1 %v2419_v7  ;;  %v2436_v24 = vld [vmem:[%s3216_s23 + $0x70] sm:$0xff]   ;;  %v2440_v28 = vld [vmem:[%s3216_s23 + $0x78] sm:$0xff]   ;;  %v2449_v36 = vld [vmem:[%s3217_s28 + $0xc] ss:$20 sps:$4 sm:$0x1f]  }
  0x15   :  { %2169 = vmatprep.subr.bf16.mxu1 %v2422_v10  ;;  %v2437_v25 = vld [vmem:[%s3216_s23 + $0x30] sm:$0xff]   ;;  %v2441_v29 = vld [vmem:[%s3216_s23 + $0x38] sm:$0xff]   ;;  %v2450_v37 = vld [vmem:[%s3216_s23 + $0x100] sm:$0xff]   ;;  %496 = vmatprep.mubr.bf16.mxu1 %v2449_v36 }
  0x16   :  { %2148 = vmatpush3.bf16.msra.mxu0 %v2421_v9  ;;  %v2438_v26 = vld [vmem:[%s3216_s23 + $0xf0] sm:$0xff]   ;;  %v2442_v30 = vld [vmem:[%s3216_s23 + $0xf8] sm:$0xff]   ;;  %v2451_v38 = vld [vmem:[%s3216_s23 + $0x108] sm:$0xff]  }
  0x17   :  { %2149 = vmatprep.subr.bf16.mxu0 %v2424_v12  ;;  %v2439_v27 = vld [vmem:[%s3216_s23 + $0xb0] sm:$0xff]   ;;  %v2445_v32 = vld [vmem:[%s3217_s28 + $0x4] ss:$20 sps:$4 sm:$0x1f]   ;;  %v2455_v42 = vld [vmem:[%s3216_s23 + $0x128] sm:$0xff]  }
  0x18   :  { %2170 = vmatpush3.bf16.msra.mxu1 %v2423_v11  ;;  %v2443_v31 = vld [vmem:[%s3217_s28] ss:$20 sps:$4 sm:$0x1f]   ;;  %v2446_v33 = vld [vmem:[%s3216_s23 + $0xb8] sm:$0xff]   ;;  %455 = vmatprep.mubr.bf16.mxu0 %v2445_v32 }
  0x19   :  { %2171 = vmatprep.subr.bf16.mxu1 %v2426_v14  ;;  %v2447_v35 = vld [vmem:[%s3217_s28 + $0x8] ss:$20 sps:$4 sm:$0x1f]   ;;  %v2452_v39 = vld [vmem:[%s3216_s23 + $0x110] sm:$0xff]   ;;  %v2454_v41 = vld [vmem:[%s3216_s23 + $0x120] sm:$0xff]  }
  0x1a   :  { %2150 = vmatpush3.bf16.msra.mxu0 %v2425_v13  ;;  %v2453_v40 = vld [vmem:[%s3216_s23 + $0x118] sm:$0xff]   ;;  %v2456_v43 = vld [vmem:[%s3216_s23 + $0x130] sm:$0xff]  }
  0x1b   :  { %2151 = vmatprep.subr.bf16.mxu0 %v2428_v16 }
  0x1c   :  { %2172 = vmatpush3.bf16.msra.mxu1 %v2427_v15 }
  0x1d   :  { %2173 = vmatprep.subr.bf16.mxu1 %v2430_v18 }
  0x1e   :  { %2152 = vmatpush3.bf16.msra.mxu0 %v2429_v17 }
  0x1f   :  { %2153 = vmatprep.subr.bf16.mxu0 %v2432_v20 }
  0x20   :  { %2174 = vmatpush3.bf16.msra.mxu1 %v2431_v19 }
  0x21   :  { %2175 = vmatprep.subr.bf16.mxu1 %v2434_v22 }
  0x22   :  { %2154 = vmatpush3.bf16.msra.mxu0 %v2433_v21 }
  0x23   :  { %2155 = vmatprep.subr.bf16.mxu0 %v2436_v24 }
  0x24   :  { %2176 = vmatpush3.bf16.msra.mxu1 %v2435_v23 }
  0x25   :  { %2177 = vmatprep.subr.bf16.mxu1 %v2438_v26 }
  0x26   :  { %2156 = vmatpush3.bf16.msra.mxu0 %v2437_v25 }
  0x27   :  { %2157 = vmatprep.subr.bf16.mxu0 %v2440_v28 }
  0x28   :  { %2178 = vmatpush3.bf16.msra.mxu1 %v2439_v27 }
  0x29   :  { %2179 = vmatprep.subr.bf16.mxu1 %v2442_v30 }
  0x2a   :  { %2158 = vmatpush3.bf16.msra.mxu0 %v2441_v29 }
  0x2b   :  { %2243 = vmatprep.subr.bf16.mxu0 %v2565_v34 }
  0x2c   :  { %2180 = vmatpush3.bf16.msra.mxu1 %v2446_v33 }
  0x2d   :  { %456 = vmatmul.mubr.bf16.vlgmr.msra.gmra.mrb[0].mxu0 %v2443_v31  ;;  %2263 = vmatprep.subr.bf16.mxu1 %v2565_v34 }
  0x2e   :  { %2259 = vmatprep.mubr.msk.bf16.mxu0 %vm2566_vm0, %v2565_v34  ;;  %2244 = vmatpush3.bf16.msra.mxu0 %v2450_v37 }
  0x2f   :  { %497 = vmatmul.mubr.bf16.vlgmr.msra.gmra.mrb[0].mxu1 %v2447_v35  ;;  %2245 = vmatprep.subr.bf16.mxu0 %v2565_v34 }
  0x30   :  { %2267 = vmatprep.mubr.msk.bf16.mxu1 %vm2566_vm0, %v2565_v34 }
  0x32   :  { %2246 = vmatpush3.bf16.msra.mxu0 %v2451_v38 }
  0x33   :  { %2247 = vmatprep.subr.bf16.mxu0 %v2565_v34 }
  0x36   :  { %2248 = vmatpush3.bf16.msra.mxu0 %v2452_v39 }
  0x37   :  { %2249 = vmatprep.subr.bf16.mxu0 %v2565_v34 }
  0x3a   :  { %2250 = vmatpush3.bf16.msra.mxu0 %v2453_v40 }
  0x3b   :  { %2251 = vmatprep.subr.bf16.mxu0 %v2565_v34 }
  0x3e   :  { %2252 = vmatpush3.bf16.msra.mxu0 %v2454_v41 }
  0x3f   :  { %2253 = vmatprep.subr.bf16.mxu0 %v2565_v34 }
  0x42   :  { %2254 = vmatpush3.bf16.msra.mxu0 %v2455_v42 }
  0x43   :  { %2255 = vmatprep.subr.bf16.mxu0 %v2565_v34 }
  0x44   :  { %25 = vsyncpa [#allocation3], 0  ;;  %v2457_v44 = vld [vmem:[%s3216_s23 + $0x138] sm:$0xff]   ;;  %v2458_v45 = vld [vmem:[%s3217_s28 + $0x10] ss:$20 sps:$4 sm:$0x1f]  }
  0x45   :  { %s3218_s30 = sld [smem:[#allocation7_spill]]  ;;  %vm548_vm1 = vcmask 261120   ;;  %vm552_vm2 = vcmask 254976   ;;  %v2459_v18 = vld [vmem:[%s3191_s6] sm:$0xff]   ;;  %v2460_v19 = vld [vmem:[%s3191_s6 + $0x8] sm:$0xff]   ;;  %s3219_s25 = sld [smem:[#allocation9_spill]] }
  0x46   :  { %2256 = vmatpush3.bf16.msra.mxu0 %v2456_v43  ;;  %2264 = vmatpush3.bf16.msra.mxu1 %v2459_v18  ;;  %v2058_v32 = vld [vmem:[%s3190_s5] ss:$0 sm:$0xff]  ;;  %s2567_s29 = smov 96   ;;  %s2569_s23 = smov 112   ;;  %vm665_vm3 = vcmask 130048   ;;  %vm713_vm4 = vcmask 80896  }
  0x47   :  { %2257 = vmatprep.subr.bf16.mxu0 %v2565_v34  ;;  %2265 = vmatprep.subr.bf16.mxu1 %v2565_v34  ;;  %v2059_v38 = vld [vmem:[%s3192_s7] ss:$0 sm:$0xff]  ;;  %s3220_s21 = sld [smem:[#allocation6_spill]]  ;;  %vm717_vm5 = vcmask 74752   ;;  %s2570_s24 = smov 64   ;;  %vm743_vm6 = vcmask 1044480  }
  0x48   :  { %s2571_s2 = smov 48   ;;  %s2572_s0 = smov 16   ;;  %vm1156_vm7 = vcmask 523264  }
  0x4a   :  { %2258 = vmatpush3.bf16.msra.mxu0 %v2457_v44  ;;  %2266 = vmatpush3.bf16.msra.mxu1 %v2460_v19 }
  0x4b   :  { %2289 = vmatprep.subr.bf16.mxu0 %v2565_v34  ;;  %v155_v47 = vld [vmem:[%s3218_s30] sm:$0xff]  ;;  %v156_v52 = vld [vmem:[%s3218_s30 + $0x8] sm:$0x3]  ;;  %2271 = vmatprep.subr.bf16.mxu1 %v2565_v34  ;;  %s2568_s30 = smov 80  }
  0x4c   :  { %v2057_v28 = vld [vmem:[%s3219_s25] ss:$0 sm:$0xff] }
  0x4d   :  { %2260 = vmatmul.mubr.bf16.vlgmr.msra.gmra.mrb[4].mxu0 %v2458_v45 }
  0x4e   :  { %2291 = vmatprep.mubr.msk.bf16.mxu0 %vm2566_vm0, %v2565_v34 }
 0x100   :  { %v2159_v46 = vpop.f32.mrb[0].mxu0 }
 0x101   :  { %v2160_v48 = vpop.f32.mrb[1].mxu0 }
 0x102   :  { %v2161_v49 = vadd.f32 %v2160_v48, %v2159_v46  ;;  %v2162_v50 = vpop.f32.mrb[2].mxu0  ;;  %v2181_v51 = vpop.f32.mrb[0].mxu1  ;;  %v2887_v48 = vld [vmem:[%s3220_s21] sm:$0xff] }
 0x103   :  { %v2163_v53 = vpop.f32.mrb[3].mxu0  ;;  %v2182_v54 = vpop.f32.mrb[1].mxu1 }
 0x104   :  { %v458_v55 = vadd.f32 %v2161_v49, %v155_v47  ;;  %v2164_v56 = vadd.f32 %v2163_v53, %v2162_v50  ;;  %v2183_v57 = vadd.f32 %v2182_v54, %v2181_v51  ;;  %v2184_v58 = vpop.f32.mrb[2].mxu1  ;;  %v2892_v50 = vld [vmem:[%s3220_s21 + $0x8] sm:$0x3] }
 0x105   :  { %v2185_v59 = vpop.f32.mrb[3].mxu1 }
 0x106   :  { %v461_v60 = vadd.f32 %v2164_v56, %v156_v52  ;;  %v2186_v61 = vadd.f32 %v2185_v59, %v2184_v58  ;;  %v499_v62 = vadd.f32 %v2183_v57, %v458_v55 }
 0x108   :  { %v502_v63 = vadd.f32 %v2186_v61, %v461_v60 }
 0x120   :  { %v539_v0 = vpop.f32.mrb[4].mxu0 }
 0x121   :  { %v2838_v1 = vadd.f32 %v539_v0, %v499_v62  ;;  %v2261_v2 = vpop.f32.mrb[5].mxu0 }
 0x122   :  { %v542_v3 = vpop.f32.mrb[6].mxu0 }
 0x123   :  { %v2840_v4 = vadd.f32 %v542_v3, %v502_v63  ;;  %v2262_v5 = vpop.f32.mrb[7].mxu0  ;;  %v549_v6 = vsel %vm548_vm1, %v2838_v1, 0.0 }
 0x124   :  { %550 = vadd.xlane.f32.xlu0 %v549_v6 }
 0x125   :  { %v553_v7 = vsel %vm552_vm2, %v2840_v4, 0.0 }
 0x128   :  { %554 = vadd.xlane.f32.xlu0 %v553_v7 }
 0x1b1   :  { %v551_v8 = vpop.xlane.xlu0 %550 }
 0x1b2   :  { %v557_v9 = vmul.f32 0.03125, %v551_v8 }
 0x1b4   :  { %v559_v10 = vsub.f32 %v2838_v1, %v557_v9 }
 0x1b5   :  { %v555_v11 = vpop.xlane.xlu0 %554 }
 0x1b6   :  { %v558_v12 = vmul.f32 0.03125, %v555_v11  ;;  %v561_v13 = vmul.f32 %v559_v10, %v559_v10 }
 0x1b8   :  { %v560_v14 = vsub.f32 %v2840_v4, %v558_v12  ;;  %v563_v15 = vsel %vm548_vm1, %v561_v13, 0.0 }
 0x1b9   :  { %564 = vadd.xlane.f32.xlu1 %v563_v15 }
 0x1ba   :  { %v562_v16 = vmul.f32 %v560_v14, %v560_v14 }
 0x1bc   :  { %v566_v17 = vsel %vm552_vm2, %v562_v16, 0.0 }
 0x1bd   :  { %567 = vadd.xlane.f32.xlu1 %v566_v17 }
 0x246   :  { %v565_v20 = vpop.xlane.xlu1 %564 }
 0x247   :  { %v569_v21 = vmul.f32 0.03125, %v565_v20 }
 0x249   :  { %v571_v22 = vadd.f32 1e-06, %v569_v21 }
 0x24a   :  { %v568_v23 = vpop.xlane.xlu1 %567 }
 0x24b   :  { %2481 = vrsqrt.f32 %v571_v22  ;;  %v570_v24 = vmul.f32 0.03125, %v568_v23 }
 0x24d   :  { %v572_v25 = vadd.f32 1e-06, %v570_v24 }
 0x24f   :  { %2483 = vrsqrt.f32 %v572_v25 }
 0x255   :  { %v2482_v26 = vpop.eup %2481 }
 0x256   :  { %v575_v27 = vmul.f32 %v2482_v26, %v559_v10 }
 0x258   :  { %v583_v30 = vmul.f32 %v2057_v28, %v575_v27 }
 0x259   :  { %v2484_v29 = vpop.eup %2483 }
 0x25a   :  { %v576_v31 = vmul.f32 %v2484_v29, %v560_v14  ;;  %v591_v35 = vadd.f32 %v2058_v32, %v583_v30 }
 0x25c   :  { %v584_v33 = vmul.f32 %v2057_v28, %v576_v31 }
 0x25e   :  { %v592_v36 = vadd.f32 %v2058_v32, %v584_v33 }
 0x260   :  { %v593_v37 = vpack.c.bf16 %v592_v36, %v591_v35 }
 0x262   :  { %2268 = vmatmul.mubr.msk.bf16.vlgmr.msra.gmra.mrb[4].mxu1 %vm548_vm1, %v593_v37 }
 0x263   :  { %2273 = vmatprep.mubr.msk.bf16.mxu1 %vm2566_vm0, %v2565_v34 }
 0x335   :  { %v654_v39 = vpop.f32.mrb[4].mxu1 }
 0x336   :  { %v2269_v40 = vpop.f32.mrb[5].mxu1  ;;  %v655_v42 = vadd.f32 %v2059_v38, %v654_v39 }
 0x337   :  { %v657_v41 = vpop.f32.mrb[6].mxu1 }
 0x338   :  { %v658_v43 = vadd.f32 %v2059_v38, %v657_v41  ;;  %v2270_v44 = vpop.f32.mrb[7].mxu1 }
 0x33a   :  { %v2870_v45 = vpack.c.bf16 %v658_v43, %v655_v42 }
 0x33c   :  { %663 = vrot.lane.b32.xlu0 %v2870_v45, %s2567_s29 }
 0x340   :  { %790 = vrot.lane.b32.xlu0 %v2870_v45, %s2568_s30 }
 0x344   :  { %788 = vrot.lane.b32.xlu0 %v2870_v45, %s2569_s23 }
 0x3ae   :  { %v664_v46 = vpop.permute.xlu0 %663 }
 0x3af   :  { %v670_v47 = vsel %vm665_vm3, %v664_v46, 0 }
 0x3b0   :  { %2272 = vmatpush3.bf16.xpose.msra.mxu1 %v670_v47 }
 0x3b1   :  { %2277 = vmatprep.subr.bf16.mxu1 %v2565_v34 }
 0x3b2   :  { %v791_v14 = vpop.permute.xlu0 %790 }
 0x3b3   :  { %v796_v16 = vsel %vm665_vm3, %v791_v14, 0 }
 0x3b6   :  { %v789_v17 = vpop.permute.xlu0 %788 }
 0x3b7   :  { %2274 = vmatmul.mubr.msk.bf16.vlgmr.msra.gmra.mrb[8].mxu1 %vm665_vm3, %v2870_v45 }
 0x3b8   :  { %2279 = vmatprep.mubr.msk.bf16.mxu1 %vm2566_vm0, %v2565_v34 }
 0x48a   :  { %v706_v49 = vpop.f32.mrb[8].mxu1 }
 0x48b   :  { %v707_v51 = vadd.f32 %v706_v49, %v2887_v48  ;;  %v2275_v52 = vpop.f32.mrb[9].mxu1 }
 0x48c   :  { %v709_v53 = vpop.f32.mrb[10].mxu1 }
 0x48d   :  { %v710_v54 = vadd.f32 %v709_v53, %v2892_v50  ;;  %v2276_v55 = vpop.f32.mrb[11].mxu1  ;;  %v714_v56 = vsel %vm713_vm4, %v707_v51, -inf  ;;  %v2462_v53 = vld [vmem:[%s3193_s8 + $0x8] sm:$0xff]  }
 0x48e   :  { %715 = vmax.xlane.f32.xlu1 %v714_v56 }
 0x48f   :  { %v718_v57 = vsel %vm717_vm5, %v710_v54, -inf }
 0x492   :  { %719 = vmax.xlane.f32.xlu1 %v718_v57 }
 0x51b   :  { %v716_v58 = vpop.xlane.xlu1 %715 }
 0x51c   :  { %v721_v59 = vsub.f32 %v707_v51, %v716_v58 }
 0x51e   :  { %v723_v60 = vmul.f32 1.442695, %v721_v59 }
 0x51f   :  { %v720_v61 = vpop.xlane.xlu1 %719 }
 0x520   :  { %2485 = vpow2.f32 %v723_v60  ;;  %v722_v62 = vsub.f32 %v710_v54, %v720_v61 }
 0x522   :  { %v725_v63 = vmul.f32 1.442695, %v722_v62 }
 0x524   :  { %2487 = vpow2.f32 %v725_v63 }
 0x52a   :  { %v2486_v0 = vpop.eup %2485 }
 0x52b   :  { %v727_v2 = vsel %vm713_vm4, %v2486_v0, 0.0 }
 0x52c   :  { %728 = vadd.xlane.f32.xlu1 %v727_v2 }
 0x52e   :  { %v2488_v3 = vpop.eup %2487 }
 0x52f   :  { %v730_v5 = vsel %vm717_vm5, %v2488_v3, 0.0 }
 0x530   :  { %731 = vadd.xlane.f32.xlu1 %v730_v5 }
 0x541   :  { %738 = vrot.lane.b32.xlu1 %v2870_v45, %s2570_s24 }
 0x5b9   :  { %v729_v6 = vpop.xlane.xlu1 %728 }
 0x5ba   :  { %2489 = vrcp.f32 %v729_v6 }
 0x5bd   :  { %v732_v7 = vpop.xlane.xlu1 %731 }
 0x5be   :  { %2491 = vrcp.f32 %v732_v7 }
 0x5c1   :  { %v739_v8 = vpop.permute.xlu1 %738 }
 0x5c2   :  { %v745_v9 = vsel %vm743_vm6, %v739_v8, 0 }
 0x5c3   :  { %2278 = vmatpush3.bf16.msra.mxu1 %v745_v9 }
 0x5c4   :  { %2283 = vmatprep.subr.bf16.mxu1 %v2565_v34  ;;  %v2490_v10 = vpop.eup %2489 }
 0x5c5   :  { %v735_v12 = vmul.f32 %v2490_v10, %v2486_v0 }
 0x5c8   :  { %v2492_v11 = vpop.eup %2491 }
 0x5c9   :  { %v736_v13 = vmul.f32 %v2492_v11, %v2488_v3  ;;  %v2070_v3 = vld [vmem:[%s3194_s9] ss:$0 sm:$0xff] }
 0x5cb   :  { %v737_v15 = vpack.c.bf16 %v736_v13, %v735_v12 }
 0x5cd   :  { %2280 = vmatmul.mubr.msk.bf16.vlgmr.msra.gmra.mrb[12].mxu1 %vm713_vm4, %v737_v15 }
 0x5ce   :  { %2284 = vmatpush3.bf16.xpose.msra.mxu1 %v796_v16  ;;  %2285 = vmatprep.mubr.msk.bf16.mxu1 %vm2566_vm0, %v2565_v34 }
 0x5cf   :  { %2295 = vmatprep.subr.bf16.mxu1 %v2565_v34 }
 0x5d5   :  { %2286 = vmatmul.mubr.msk.bf16.vlgmr.msra.gmra.mrb[16].mxu1 %vm665_vm3, %v789_v17 }
 0x5d6   :  { %2299 = vmatprep.mubr.msk.bf16.mxu1 %vm2566_vm0, %v2565_v34 }
 0x6a0   :  { %v2912_v18 = vpop.f32.mrb[12].mxu1 }
 0x6a1   :  { %v2281_v19 = vpop.f32.mrb[13].mxu1 }
 0x6a2   :  { %v784_v20 = vpop.f32.mrb[14].mxu1 }
 0x6a3   :  { %v2282_v21 = vpop.f32.mrb[15].mxu1 }
 0x6a8   :  { %v832_v22 = vpop.f32.mrb[16].mxu1 }
 0x6a9   :  { %v833_v23 = vadd.f32 %v832_v22, %v2887_v48  ;;  %v2287_v24 = vpop.f32.mrb[17].mxu1  ;;  %v2463_v22 = vld [vmem:[%s3197_s12] sm:$0xff]  }
 0x6aa   :  { %v835_v25 = vpop.f32.mrb[18].mxu1 }
 0x6ab   :  { %v836_v26 = vadd.f32 %v835_v25, %v2892_v50  ;;  %v2288_v27 = vpop.f32.mrb[19].mxu1  ;;  %v839_v28 = vsel %vm713_vm4, %v833_v23, -inf }
 0x6ac   :  { %840 = vmax.xlane.f32.xlu0 %v839_v28 }
 0x6ad   :  { %v842_v29 = vsel %vm717_vm5, %v836_v26, -inf }
 0x6ae   :  { %843 = vmax.xlane.f32.xlu1 %v842_v29 }
 0x739   :  { %v841_v30 = vpop.xlane.xlu0 %840 }
 0x73a   :  { %v845_v31 = vsub.f32 %v833_v23, %v841_v30  ;;  %v2464_v23 = vld [vmem:[%s3197_s12 + $0x8] sm:$0xff]  }
 0x73b   :  { %v844_v32 = vpop.xlane.xlu1 %843 }
 0x73c   :  { %v847_v33 = vmul.f32 1.442695, %v845_v31  ;;  %v846_v35 = vsub.f32 %v836_v26, %v844_v32  ;;  %v2071_v31 = vld [vmem:[%s3195_s10] ss:$0 sm:$0xff] }
 0x73e   :  { %2493 = vpow2.f32 %v847_v33  ;;  %v849_v36 = vmul.f32 1.442695, %v846_v35 }
 0x740   :  { %2495 = vpow2.f32 %v849_v36 }
 0x748   :  { %v2494_v37 = vpop.eup %2493 }
 0x749   :  { %v851_v38 = vsel %vm713_vm4, %v2494_v37, 0.0 }
 0x74a   :  { %v2496_v39 = vpop.eup %2495  ;;  %852 = vadd.xlane.f32.xlu0 %v851_v38 }
 0x74b   :  { %v854_v40 = vsel %vm717_vm5, %v2496_v39, 0.0 }
 0x74e   :  { %855 = vadd.xlane.f32.xlu0 %v854_v40 }
 0x764   :  { %862 = vrot.lane.b32.xlu0 %v2870_v45, %s2571_s2  ;;  %v2461_v45 = vld [vmem:[%s3193_s8] sm:$0xff]  }
 0x765   :  { %2296 = vmatpush3.bf16.msra.mxu1 %v2461_v45 }
 0x766   :  { %2297 = vmatprep.subr.bf16.mxu1 %v2565_v34 }
 0x769   :  { %2298 = vmatpush3.bf16.msra.mxu1 %v2462_v53 }
 0x76a   :  { %2311 = vmatprep.subr.bf16.mxu1 %v2565_v34 }
 0x7d7   :  { %v853_v41 = vpop.xlane.xlu0 %852 }
 0x7d8   :  { %2497 = vrcp.f32 %v853_v41 }
 0x7db   :  { %v856_v42 = vpop.xlane.xlu0 %855 }
 0x7dc   :  { %2499 = vrcp.f32 %v856_v42  ;;  %v2465_v42 = vld [vmem:[%s3199_s14] sm:$0xff]  }
 0x7df   :  { %v863_v43 = vpop.permute.xlu0 %862 }
 0x7e0   :  { %v868_v44 = vsel %vm743_vm6, %v863_v43, 0  ;;  %v2466_v43 = vld [vmem:[%s3199_s14 + $0x8] sm:$0xff]  }
 0x7e1   :  { %2290 = vmatpush3.bf16.msra.mxu0 %v868_v44  ;;  %v2467_v44 = vld [vmem:[%s3199_s14 + $0x10] sm:$0xff]  }
 0x7e2   :  { %2303 = vmatprep.subr.bf16.mxu0 %v2565_v34  ;;  %v2498_v46 = vpop.eup %2497 }
 0x7e3   :  { %v859_v49 = vmul.f32 %v2498_v46, %v2494_v37  ;;  %v2072_v37 = vld [vmem:[%s3196_s11] ss:$0 sm:$0xff]  ;;  %v2468_v46 = vld [vmem:[%s3199_s14 + $0x18] sm:$0xff]  }
 0x7e6   :  { %v2500_v47 = vpop.eup %2499 }
 0x7e7   :  { %v860_v51 = vmul.f32 %v2500_v47, %v2496_v39  ;;  %v2073_v47 = vld [vmem:[%s3198_s13] ss:$0 sm:$0xff] }
 0x7e9   :  { %v861_v52 = vpack.c.bf16 %v860_v51, %v859_v49 }
 0x7eb   :  { %2292 = vmatmul.mubr.msk.bf16.vlgmr.msra.gmra.mrb[8].mxu0 %vm713_vm4, %v861_v52 }
 0x7ec   :  { %2307 = vmatprep.mubr.msk.bf16.mxu0 %vm2566_vm0, %v2565_v34  ;;  %2304 = vmatpush3.bf16.msra.mxu0 %v2463_v22 }
 0x7ed   :  { %2305 = vmatprep.subr.bf16.mxu0 %v2565_v34 }
 0x7f0   :  { %2306 = vmatpush3.bf16.msra.mxu0 %v2464_v23 }
 0x7f1   :  { %2323 = vmatprep.subr.bf16.mxu0 %v2565_v34 }
 0x8be   :  { %v904_v54 = vpop.f32.mrb[8].mxu0 }
 0x8bf   :  { %v2293_v55 = vpop.f32.mrb[9].mxu0 }
 0x8c0   :  { %v907_v56 = vpop.f32.mrb[10].mxu0 }
 0x8c1   :  { %v2402_v57 = vpack.i.bf16 %v907_v56, %v904_v54  ;;  %v2294_v58 = vpop.f32.mrb[11].mxu0 }
 0x8c3   :  { %2403 = vrot.lane.b32.xlu1 %v2402_v57, %s2572_s0 }
 0x935   :  { %v2404_v59 = vpop.permute.xlu1 %2403 }
 0x936   :  { %v2406_v60 = vunpack.i.h.bf16 %v2404_v59  ;;  %v2405_v61 = vunpack.i.l.bf16 %v2404_v59 }
 0x938   :  { %v920_v62 = vsel %vm665_vm3, %v784_v20, %v2406_v60  ;;  %v919_v63 = vsel %vm665_vm3, %v2912_v18, %v2405_v61 }
 0x939   :  { %v921_v0 = vpack.c.bf16 %v920_v62, %v919_v63 }
 0x93b   :  { %2300 = vmatmul.mubr.msk.bf16.vlgmr.msra.gmra.mrb[20].mxu1 %vm548_vm1, %v921_v0 }
 0x93c   :  { %2319 = vmatprep.mubr.msk.bf16.mxu1 %vm2566_vm0, %v2565_v34  ;;  %2312 = vmatpush3.bf16.msra.mxu1 %v2465_v42 }
 0x93d   :  { %2313 = vmatprep.subr.bf16.mxu1 %v2565_v34 }
 0x940   :  { %2314 = vmatpush3.bf16.msra.mxu1 %v2466_v43 }
 0x941   :  { %2315 = vmatprep.subr.bf16.mxu1 %v2565_v34 }
 0x944   :  { %2316 = vmatpush3.bf16.msra.mxu1 %v2467_v44 }
 0x945   :  { %2317 = vmatprep.subr.bf16.mxu1 %v2565_v34 }
 0x948   :  { %2318 = vmatpush3.bf16.msra.mxu1 %v2468_v46 }
 0x949   :  { %2337 = vmatprep.subr.bf16.mxu1 %v2565_v34 }
 0xa0e   :  { %v975_v2 = vpop.f32.mrb[20].mxu1 }
 0xa0f   :  { %v982_v5 = vadd.f32 %v975_v2, %v2838_v1  ;;  %v2301_v6 = vpop.f32.mrb[21].mxu1 }
 0xa10   :  { %v978_v7 = vpop.f32.mrb[22].mxu1 }
 0xa11   :  { %v2946_v8 = vadd.f32 %v2070_v3, %v982_v5  ;;  %v983_v9 = vadd.f32 %v978_v7, %v2840_v4  ;;  %v2302_v10 = vpop.f32.mrb[23].mxu1 }
 0xa13   :  { %v2949_v11 = vadd.f32 %v2070_v3, %v983_v9  ;;  %v995_v12 = vsel %vm548_vm1, %v2946_v8, 0.0 }
 0xa14   :  { %996 = vadd.xlane.f32.xlu1 %v995_v12 }
 0xa15   :  { %v998_v13 = vsel %vm552_vm2, %v2949_v11, 0.0 }
 0xa16   :  { %999 = vadd.xlane.f32.xlu0 %v998_v13 }
 0xaa1   :  { %v997_v14 = vpop.xlane.xlu1 %996 }
 0xaa2   :  { %v1001_v15 = vmul.f32 0.03125, %v997_v14 }
 0xaa3   :  { %v1000_v1 = vpop.xlane.xlu0 %999 }
 0xaa4   :  { %v1003_v16 = vsub.f32 %v2946_v8, %v1001_v15  ;;  %v1002_v17 = vmul.f32 0.03125, %v1000_v1  ;;  %v2082_v15 = vld [vmem:[%s3200_s15] ss:$0 sm:$0xff] }
 0xaa6   :  { %v1004_v18 = vsub.f32 %v2949_v11, %v1002_v17  ;;  %v1005_v4 = vmul.f32 %v1003_v16, %v1003_v16 }
 0xaa8   :  { %v1007_v19 = vsel %vm548_vm1, %v1005_v4, 0.0  ;;  %v1006_v20 = vmul.f32 %v1004_v18, %v1004_v18 }
 0xaa9   :  { %1008 = vadd.xlane.f32.xlu0 %v1007_v19 }
 0xaaa   :  { %v1010_v21 = vsel %vm552_vm2, %v1006_v20, 0.0 }
 0xaab   :  { %1011 = vadd.xlane.f32.xlu1 %v1010_v21 }
 0xb36   :  { %v1009_v24 = vpop.xlane.xlu0 %1008 }
 0xb37   :  { %v1013_v25 = vmul.f32 0.03125, %v1009_v24 }
 0xb38   :  { %v1012_v26 = vpop.xlane.xlu1 %1011 }
 0xb39   :  { %v1015_v27 = vadd.f32 1e-06, %v1013_v25  ;;  %v1014_v28 = vmul.f32 0.03125, %v1012_v26 }
 0xb3b   :  { %2501 = vrsqrt.f32 %v1015_v27  ;;  %v1016_v29 = vadd.f32 1e-06, %v1014_v28 }
 0xb3d   :  { %2503 = vrsqrt.f32 %v1016_v29 }
 0xb45   :  { %v2502_v30 = vpop.eup %2501 }
 0xb46   :  { %v1019_v32 = vmul.f32 %v2502_v30, %v1003_v16 }
 0xb47   :  { %v2504_v33 = vpop.eup %2503 }
 0xb48   :  { %v1027_v35 = vmul.f32 %v2071_v31, %v1019_v32  ;;  %v1020_v36 = vmul.f32 %v2504_v33, %v1004_v18  ;;  %v2470_v32 = vld [vmem:[%s3191_s6 + $0x18] sm:$0xff]  }
 0xb4a   :  { %v1028_v38 = vmul.f32 %v2071_v31, %v1020_v36  ;;  %v1035_v39 = vadd.f32 %v2072_v37, %v1027_v35  ;;  %v2469_v31 = vld [vmem:[%s3191_s6 + $0x10] sm:$0xff]  }
 0xb4c   :  { %v1036_v40 = vadd.f32 %v2072_v37, %v1028_v38 }
 0xb4e   :  { %v1037_v41 = vpack.c.bf16 %v1036_v40, %v1035_v39 }
 0xb50   :  { %2308 = vmatmul.mubr.msk.bf16.vlgmr.msra.gmra.mrb[12].mxu0 %vm548_vm1, %v1037_v41  ;;  %v2085_v41 = vld [vmem:[%s3219_s25 + $0x1] ss:$0 sm:$0xff] }
 0xb51   :  { %2327 = vmatprep.mubr.msk.bf16.mxu0 %vm2566_vm0, %v2565_v34  ;;  %2324 = vmatpush3.bf16.msra.mxu0 %v2469_v31 }
 0xb52   :  { %2325 = vmatprep.subr.bf16.mxu0 %v2565_v34 }
 0xb55   :  { %2326 = vmatpush3.bf16.msra.mxu0 %v2470_v32 }
 0xb56   :  { %2331 = vmatprep.subr.bf16.mxu0 %v2565_v34 }
 0xc23   :  { %v1098_v49 = vpop.f32.mrb[12].mxu0 }
 0xc24   :  { %v1099_v51 = vadd.f32 %v2073_v47, %v1098_v49  ;;  %v2309_v52 = vpop.f32.mrb[13].mxu0 }
 0xc25   :  { %v1101_v45 = vpop.f32.mrb[14].mxu0 }
 0xc26   :  { %v1107_v53 = vmul.f32 0.044715, %v1099_v51  ;;  %v1102_v54 = vadd.f32 %v2073_v47, %v1101_v45  ;;  %v2310_v55 = vpop.f32.mrb[15].mxu0  ;;  %v1105_v6 = vmul.f32 0.5, %v1099_v51  ;;  %v2086_v47 = vld [vmem:[%s3190_s5 + $0x1] ss:$0 sm:$0xff] }
 0xc28   :  { %v1109_v56 = vmul.f32 %v1107_v53, %v1099_v51  ;;  %v1108_v57 = vmul.f32 0.044715, %v1102_v54  ;;  %v1106_v7 = vmul.f32 0.5, %v1102_v54  ;;  %v2092_v53 = vld [vmem:[%s3192_s7 + $0x1] ss:$0 sm:$0xff] }
 0xc2a   :  { %v1111_v58 = vmul.f32 %v1109_v56, %v1099_v51  ;;  %v1110_v59 = vmul.f32 %v1108_v57, %v1102_v54 }
 0xc2c   :  { %v1113_v60 = vadd.f32 %v1111_v58, %v1099_v51  ;;  %v1112_v61 = vmul.f32 %v1110_v59, %v1102_v54 }
 0xc2e   :  { %v1115_v62 = vmul.f32 0.7978846, %v1113_v60  ;;  %v1114_v63 = vadd.f32 %v1112_v61, %v1102_v54 }
 0xc30   :  { %2505 = vtanh.f32 %v1115_v62  ;;  %v1116_v0 = vmul.f32 0.7978846, %v1114_v63 }
 0xc32   :  { %2507 = vtanh.f32 %v1116_v0 }
 0xc3a   :  { %v2506_v2 = vpop.eup %2505 }
 0xc3b   :  { %v1119_v3 = vadd.f32 1.0, %v2506_v2 }
 0xc3c   :  { %v2508_v5 = vpop.eup %2507 }
 0xc3d   :  { %v1120_v9 = vadd.f32 1.0, %v2508_v5  ;;  %v1121_v10 = vmul.f32 %v1119_v3, %v1105_v6 }
 0xc3f   :  { %v1122_v12 = vmul.f32 %v1120_v9, %v1106_v7 }
 0xc41   :  { %v1123_v13 = vpack.c.bf16 %v1122_v12, %v1121_v10 }
 0xc43   :  { %2320 = vmatmul.mubr.msk.bf16.vlgmr.msra.gmra.mrb[24].mxu1 %vm1156_vm7, %v1123_v13 }
 0xc44   :  { %2339 = vmatprep.mubr.msk.bf16.mxu1 %vm2566_vm0, %v2565_v34 }
 0xd16   :  { %v1194_v14 = vpop.f32.mrb[24].mxu1 }
 0xd17   :  { %v1201_v1 = vadd.f32 %v1194_v14, %v2946_v8  ;;  %v2321_v16 = vpop.f32.mrb[25].mxu1 }
 0xd18   :  { %v1197_v17 = vpop.f32.mrb[26].mxu1 }
 0xd19   :  { %v3002_v18 = vadd.f32 %v2082_v15, %v1201_v1  ;;  %v1202_v4 = vadd.f32 %v1197_v17, %v2949_v11  ;;  %v2322_v19 = vpop.f32.mrb[27].mxu1 }
 0xd1b   :  { %v3005_v20 = vadd.f32 %v2082_v15, %v1202_v4  ;;  %v1216_v21 = vsel %vm548_vm1, %v3002_v18, 0.0 }
 0xd1c   :  { %1217 = vadd.xlane.f32.xlu0 %v1216_v21 }
 0xd1d   :  { %v1219_v22 = vsel %vm552_vm2, %v3005_v20, 0.0 }
 0xd1e   :  { %1220 = vadd.xlane.f32.xlu1 %v1219_v22 }
 0xda9   :  { %v1218_v23 = vpop.xlane.xlu0 %1217 }
 0xdaa   :  { %v1222_v24 = vmul.f32 0.03125, %v1218_v23 }
 0xdab   :  { %v1221_v8 = vpop.xlane.xlu1 %1220 }
 0xdac   :  { %v1224_v25 = vsub.f32 %v3002_v18, %v1222_v24  ;;  %v1223_v26 = vmul.f32 0.03125, %v1221_v8 }
 0xdae   :  { %v1225_v27 = vsub.f32 %v3005_v20, %v1223_v26  ;;  %v1226_v11 = vmul.f32 %v1224_v25, %v1224_v25 }
 0xdb0   :  { %v1228_v28 = vsel %vm548_vm1, %v1226_v11, 0.0  ;;  %v1227_v29 = vmul.f32 %v1225_v27, %v1225_v27 }
 0xdb1   :  { %1229 = vadd.xlane.f32.xlu0 %v1228_v28 }
 0xdb2   :  { %v1231_v30 = vsel %vm552_vm2, %v1227_v29, 0.0 }
 0xdb3   :  { %1232 = vadd.xlane.f32.xlu1 %v1231_v30 }
 0xe3e   :  { %v1230_v33 = vpop.xlane.xlu0 %1229 }
 0xe3f   :  { %v1234_v35 = vmul.f32 0.03125, %v1230_v33 }
 0xe40   :  { %v1233_v36 = vpop.xlane.xlu1 %1232 }
 0xe41   :  { %v1236_v37 = vadd.f32 1e-06, %v1234_v35  ;;  %v1235_v38 = vmul.f32 0.03125, %v1233_v36 }
 0xe43   :  { %2509 = vrsqrt.f32 %v1236_v37  ;;  %v1237_v39 = vadd.f32 1e-06, %v1235_v38 }
 0xe45   :  { %2511 = vrsqrt.f32 %v1237_v39 }
 0xe4d   :  { %v2510_v40 = vpop.eup %2509 }
 0xe4e   :  { %v1240_v42 = vmul.f32 %v2510_v40, %v1224_v25 }
 0xe4f   :  { %v2512_v43 = vpop.eup %2511 }
 0xe50   :  { %v1248_v44 = vmul.f32 %v2085_v41, %v1240_v42  ;;  %v1241_v46 = vmul.f32 %v2512_v43, %v1225_v27 }
 0xe52   :  { %v1249_v49 = vmul.f32 %v2085_v41, %v1241_v46  ;;  %v1256_v51 = vadd.f32 %v2086_v47, %v1248_v44 }
 0xe54   :  { %v1257_v52 = vadd.f32 %v2086_v47, %v1249_v49 }
 0xe56   :  { %v1258_v45 = vpack.c.bf16 %v1257_v52, %v1256_v51 }
 0xe58   :  { %2328 = vmatmul.mubr.msk.bf16.vlgmr.msra.gmra.mrb[16].mxu0 %vm548_vm1, %v1258_v45 }
 0xe59   :  { %2333 = vmatprep.mubr.msk.bf16.mxu0 %vm2566_vm0, %v2565_v34 }
 0xf2b   :  { %v1321_v54 = vpop.f32.mrb[16].mxu0 }
 0xf2c   :  { %v2329_v55 = vpop.f32.mrb[17].mxu0  ;;  %v1322_v57 = vadd.f32 %v2092_v53, %v1321_v54 }
 0xf2d   :  { %v1324_v56 = vpop.f32.mrb[18].mxu0 }
 0xf2e   :  { %v1325_v58 = vadd.f32 %v2092_v53, %v1324_v56  ;;  %v2330_v59 = vpop.f32.mrb[19].mxu0 }
 0xf2f   :  { %v2471_v59 = vld [vmem:[%s3193_s8 + $0x10] sm:$0xff]  }
 0xf30   :  { %v3035_v60 = vpack.c.bf16 %v1325_v58, %v1322_v57 }
 0xf32   :  { %1453 = vrot.lane.b32.xlu1 %v3035_v60, %s2568_s30  ;;  %1330 = vrot.lane.b32.xlu0 %v3035_v60, %s2567_s29 }
 0xf36   :  { %1451 = vrot.lane.b32.xlu1 %v3035_v60, %s2569_s23 }
 0xfa4   :  { %v1331_v61 = vpop.permute.xlu0 %1330  ;;  %v1454_v63 = vpop.permute.xlu1 %1453 }
 0xfa5   :  { %v1336_v62 = vsel %vm665_vm3, %v1331_v61, 0  ;;  %v1459_v0 = vsel %vm665_vm3, %v1454_v63, 0 }
 0xfa6   :  { %2332 = vmatpush3.bf16.xpose.msra.mxu0 %v1336_v62 }
 0xfa7   :  { %2343 = vmatprep.subr.bf16.mxu0 %v2565_v34 }
 0xfa8   :  { %v1452_v2 = vpop.permute.xlu1 %1451 }
 0xfad   :  { %2334 = vmatmul.mubr.msk.bf16.vlgmr.msra.gmra.mrb[20].mxu0 %vm665_vm3, %v3035_v60 }
 0xfae   :  { %2344 = vmatpush3.bf16.xpose.msra.mxu0 %v1459_v0  ;;  %2345 = vmatprep.mubr.msk.bf16.mxu0 %vm2566_vm0, %v2565_v34  ;;  %v2472_v0 = vld [vmem:[%s3193_s8 + $0x18] sm:$0xff]  }
 0xfaf   :  { %2355 = vmatprep.subr.bf16.mxu0 %v2565_v34 }
 0xfb5   :  { %2346 = vmatmul.mubr.msk.bf16.vlgmr.msra.gmra.mrb[24].mxu0 %vm665_vm3, %v1452_v2 }
 0xfb6   :  { %2359 = vmatprep.mubr.msk.bf16.mxu0 %vm2566_vm0, %v2565_v34  ;;  %2356 = vmatpush3.bf16.msra.mxu0 %v2471_v59 }
 0xfb7   :  { %2357 = vmatprep.subr.bf16.mxu0 %v2565_v34 }
 0xfba   :  { %2358 = vmatpush3.bf16.msra.mxu0 %v2472_v0 }
 0xfbb   :  { %2371 = vmatprep.subr.bf16.mxu0 %v2565_v34 }
0x1080   :  { %v1372_v3 = vpop.f32.mrb[20].mxu0 }
0x1081   :  { %v1373_v5 = vadd.f32 %v1372_v3, %v2887_v48  ;;  %v2335_v6 = vpop.f32.mrb[21].mxu0 }
0x1082   :  { %v1375_v7 = vpop.f32.mrb[22].mxu0 }
0x1083   :  { %v1376_v9 = vadd.f32 %v1375_v7, %v2892_v50  ;;  %v2336_v10 = vpop.f32.mrb[23].mxu0  ;;  %v1379_v12 = vsel %vm713_vm4, %v1373_v5, -inf }
0x1084   :  { %1380 = vmax.xlane.f32.xlu1 %v1379_v12 }
0x1085   :  { %v1382_v13 = vsel %vm717_vm5, %v1376_v9, -inf }
0x1086   :  { %1383 = vmax.xlane.f32.xlu0 %v1382_v13 }
0x1088   :  { %v1495_v14 = vpop.f32.mrb[24].mxu0 }
0x1089   :  { %v1496_v15 = vadd.f32 %v1495_v14, %v2887_v48  ;;  %v2347_v1 = vpop.f32.mrb[25].mxu0 }
0x108a   :  { %v1498_v16 = vpop.f32.mrb[26].mxu0 }
0x108b   :  { %v1499_v17 = vadd.f32 %v1498_v16, %v2892_v50  ;;  %v2348_v4 = vpop.f32.mrb[27].mxu0  ;;  %v1502_v19 = vsel %vm713_vm4, %v1496_v15, -inf  ;;  %v2108_v16 = vld [vmem:[%s3194_s9 + $0x1] ss:$0 sm:$0xff] }
0x108c   :  { %1503 = vmax.xlane.f32.xlu0 %v1502_v19 }
0x108d   :  { %v1505_v21 = vsel %vm717_vm5, %v1499_v17, -inf }
0x1090   :  { %1506 = vmax.xlane.f32.xlu0 %v1505_v21 }
0x1111   :  { %v1381_v22 = vpop.xlane.xlu1 %1380 }
0x1112   :  { %v1385_v23 = vsub.f32 %v1373_v5, %v1381_v22 }
0x1113   :  { %v1384_v24 = vpop.xlane.xlu0 %1383 }
0x1114   :  { %v1387_v8 = vmul.f32 1.442695, %v1385_v23  ;;  %v1386_v25 = vsub.f32 %v1376_v9, %v1384_v24 }
0x1116   :  { %2513 = vpow2.f32 %v1387_v8  ;;  %v1389_v26 = vmul.f32 1.442695, %v1386_v25 }
0x1118   :  { %2515 = vpow2.f32 %v1389_v26 }
0x1119   :  { %v1504_v48 = vpop.xlane.xlu0 %1503 }
0x111a   :  { %v1508_v27 = vsub.f32 %v1496_v15, %v1504_v48 }
0x111c   :  { %v1510_v11 = vmul.f32 1.442695, %v1508_v27 }
0x111d   :  { %v1507_v28 = vpop.xlane.xlu0 %1506 }
0x111e   :  { %2517 = vpow2.f32 %v1510_v11  ;;  %v1509_v50 = vsub.f32 %v1499_v17, %v1507_v28 }
0x1120   :  { %v2514_v29 = vpop.eup %2513  ;;  %v1512_v30 = vmul.f32 1.442695, %v1509_v50 }
0x1121   :  { %v1391_v31 = vsel %vm713_vm4, %v2514_v29, 0.0 }
0x1122   :  { %v2516_v32 = vpop.eup %2515  ;;  %2519 = vpow2.f32 %v1512_v30  ;;  %1392 = vadd.xlane.f32.xlu1 %v1391_v31  ;;  %v2473_v31 = vld [vmem:[%s3197_s12 + $0x10] sm:$0xff]  }
0x1123   :  { %v1394_v33 = vsel %vm717_vm5, %v2516_v32, 0.0 }
0x1124   :  { %1395 = vadd.xlane.f32.xlu0 %v1394_v33 }
0x1128   :  { %v2518_v35 = vpop.eup %2517 }
0x1129   :  { %v1514_v36 = vsel %vm713_vm4, %v2518_v35, 0.0 }
0x112a   :  { %1515 = vadd.xlane.f32.xlu1 %v1514_v36 }
0x112c   :  { %v2520_v37 = vpop.eup %2519 }
0x112d   :  { %v1517_v38 = vsel %vm717_vm5, %v2520_v37, 0.0 }
0x112e   :  { %1518 = vadd.xlane.f32.xlu0 %v1517_v38 }
0x113b   :  { %1402 = vrot.lane.b32.xlu1 %v3035_v60, %s2570_s24 }
0x1144   :  { %1525 = vrot.lane.b32.xlu0 %v3035_v60, %s2571_s2 }
0x11af   :  { %v1393_v39 = vpop.xlane.xlu1 %1392 }
0x11b0   :  { %2521 = vrcp.f32 %v1393_v39 }
0x11b1   :  { %v1396_v40 = vpop.xlane.xlu0 %1395 }
0x11b2   :  { %2523 = vrcp.f32 %v1396_v40 }
0x11b7   :  { %v1516_v41 = vpop.xlane.xlu1 %1515 }
0x11b8   :  { %2525 = vrcp.f32 %v1516_v41  ;;  %v2111_v41 = vld [vmem:[%s3195_s10 + $0x1] ss:$0 sm:$0xff] }
0x11ba   :  { %v2522_v42 = vpop.eup %2521 }
0x11bb   :  { %v1403_v43 = vpop.permute.xlu1 %1402  ;;  %v1519_v44 = vpop.xlane.xlu0 %1518  ;;  %v1399_v49 = vmul.f32 %v2522_v42, %v2514_v29 }
0x11bc   :  { %v2524_v46 = vpop.eup %2523  ;;  %v1408_v47 = vsel %vm743_vm6, %v1403_v43, 0  ;;  %2527 = vrcp.f32 %v1519_v44 }
0x11bd   :  { %v1400_v51 = vmul.f32 %v2524_v46, %v2516_v32  ;;  %2338 = vmatpush3.bf16.msra.mxu1 %v1408_v47  ;;  %v2474_v32 = vld [vmem:[%s3197_s12 + $0x18] sm:$0xff]   ;;  %v2112_v47 = vld [vmem:[%s3196_s11 + $0x1] ss:$0 sm:$0xff] }
0x11be   :  { %2349 = vmatprep.subr.bf16.mxu1 %v2565_v34 }
0x11bf   :  { %v1526_v52 = vpop.permute.xlu0 %1525  ;;  %v1401_v45 = vpack.c.bf16 %v1400_v51, %v1399_v49 }
0x11c0   :  { %v1531_v53 = vsel %vm743_vm6, %v1526_v52, 0 }
0x11c1   :  { %2340 = vmatmul.mubr.msk.bf16.vlgmr.msra.gmra.mrb[28].mxu1 %vm713_vm4, %v1401_v45 }
0x11c2   :  { %2350 = vmatpush3.bf16.msra.mxu1 %v1531_v53  ;;  %2351 = vmatprep.mubr.msk.bf16.mxu1 %vm2566_vm0, %v2565_v34  ;;  %v2526_v54 = vpop.eup %2525  ;;  %v2475_v53 = vld [vmem:[%s3199_s14 + $0x20] sm:$0xff]  }
0x11c3   :  { %2363 = vmatprep.subr.bf16.mxu1 %v2565_v34  ;;  %v1522_v56 = vmul.f32 %v2526_v54, %v2518_v35  ;;  %v2476_v54 = vld [vmem:[%s3199_s14 + $0x28] sm:$0xff]  }
0x11c6   :  { %v2528_v55 = vpop.eup %2527 }
0x11c7   :  { %v1523_v57 = vmul.f32 %v2528_v55, %v2520_v37  ;;  %v2477_v55 = vld [vmem:[%s3199_s14 + $0x30] sm:$0xff]  }
0x11c9   :  { %v1524_v58 = vpack.c.bf16 %v1523_v57, %v1522_v56  ;;  %v2478_v56 = vld [vmem:[%s3199_s14 + $0x38] sm:$0xff]   ;;  %v2118_v57 = vld [vmem:[%s3198_s13 + $0x1] ss:$0 sm:$0xff] }
0x11cb   :  { %2352 = vmatmul.mubr.msk.bf16.vlgmr.msra.gmra.mrb[32].mxu1 %vm713_vm4, %v1524_v58 }
0x11cc   :  { %2367 = vmatprep.mubr.msk.bf16.mxu1 %vm2566_vm0, %v2565_v34  ;;  %2364 = vmatpush3.bf16.msra.mxu1 %v2473_v31 }
0x11cd   :  { %2365 = vmatprep.subr.bf16.mxu1 %v2565_v34 }
0x11d0   :  { %2366 = vmatpush3.bf16.msra.mxu1 %v2474_v32 }
0x11d1   :  { %2383 = vmatprep.subr.bf16.mxu1 %v2565_v34 }
0x1294   :  { %v1444_v60 = vpop.f32.mrb[28].mxu1 }
0x1295   :  { %v2341_v61 = vpop.f32.mrb[29].mxu1 }
0x1296   :  { %v1447_v62 = vpop.f32.mrb[30].mxu1 }
0x1297   :  { %v2342_v63 = vpop.f32.mrb[31].mxu1 }
0x129e   :  { %v1567_v2 = vpop.f32.mrb[32].mxu1 }
0x129f   :  { %v2353_v3 = vpop.f32.mrb[33].mxu1 }
0x12a0   :  { %v1570_v5 = vpop.f32.mrb[34].mxu1 }
0x12a1   :  { %v2407_v6 = vpack.i.bf16 %v1570_v5, %v1567_v2  ;;  %v2354_v7 = vpop.f32.mrb[35].mxu1 }
0x12a3   :  { %2408 = vrot.lane.b32.xlu1 %v2407_v6, %s2572_s0 }
0x1315   :  { %v2409_v9 = vpop.permute.xlu1 %2408 }
0x1316   :  { %v2411_v10 = vunpack.i.h.bf16 %v2409_v9  ;;  %v2410_v12 = vunpack.i.l.bf16 %v2409_v9 }
0x1318   :  { %v1583_v13 = vsel %vm665_vm3, %v1447_v62, %v2411_v10  ;;  %v1582_v14 = vsel %vm665_vm3, %v1444_v60, %v2410_v12 }
0x1319   :  { %v1584_v15 = vpack.c.bf16 %v1583_v13, %v1582_v14 }
0x131b   :  { %2360 = vmatmul.mubr.msk.bf16.vlgmr.msra.gmra.mrb[28].mxu0 %vm548_vm1, %v1584_v15 }
0x131c   :  { %2379 = vmatprep.mubr.msk.bf16.mxu0 %vm2566_vm0, %v2565_v34  ;;  %2372 = vmatpush3.bf16.msra.mxu0 %v2475_v53 }
0x131d   :  { %2373 = vmatprep.subr.bf16.mxu0 %v2565_v34 }
0x1320   :  { %2374 = vmatpush3.bf16.msra.mxu0 %v2476_v54 }
0x1321   :  { %2375 = vmatprep.subr.bf16.mxu0 %v2565_v34 }
0x1324   :  { %2376 = vmatpush3.bf16.msra.mxu0 %v2477_v55 }
0x1325   :  { %2377 = vmatprep.subr.bf16.mxu0 %v2565_v34 }
0x1328   :  { %2378 = vmatpush3.bf16.msra.mxu0 %v2478_v56 }
0x13ee   :  { %v1639_v1 = vpop.f32.mrb[28].mxu0 }
0x13ef   :  { %v1646_v17 = vadd.f32 %v1639_v1, %v3002_v18  ;;  %v2361_v4 = vpop.f32.mrb[29].mxu0 }
0x13f0   :  { %v1642_v19 = vpop.f32.mrb[30].mxu0 }
0x13f1   :  { %v3098_v21 = vadd.f32 %v2108_v16, %v1646_v17  ;;  %v1647_v22 = vadd.f32 %v1642_v19, %v3005_v20  ;;  %v2362_v23 = vpop.f32.mrb[31].mxu0 }
0x13f3   :  { %v3101_v24 = vadd.f32 %v2108_v16, %v1647_v22  ;;  %v1662_v8 = vsel %vm548_vm1, %v3098_v21, 0.0 }
0x13f4   :  { %1663 = vadd.xlane.f32.xlu1 %v1662_v8 }
0x13f5   :  { %v1665_v25 = vsel %vm552_vm2, %v3101_v24, 0.0 }
0x13f6   :  { %1666 = vadd.xlane.f32.xlu0 %v1665_v25  ;;  %v2136_v25 = vld [vmem:[%s3200_s15 + $0x1] ss:$0 sm:$0xff] }
0x1481   :  { %v1664_v26 = vpop.xlane.xlu1 %1663 }
0x1482   :  { %v1668_v48 = vmul.f32 0.03125, %v1664_v26 }
0x1483   :  { %v1667_v18 = vpop.xlane.xlu0 %1666 }
0x1484   :  { %v1670_v27 = vsub.f32 %v3098_v21, %v1668_v48  ;;  %v1669_v11 = vmul.f32 0.03125, %v1667_v18 }
0x1486   :  { %v1671_v28 = vsub.f32 %v3101_v24, %v1669_v11  ;;  %v1672_v20 = vmul.f32 %v1670_v27, %v1670_v27 }
0x1488   :  { %v1674_v50 = vsel %vm548_vm1, %v1672_v20, 0.0  ;;  %v1673_v29 = vmul.f32 %v1671_v28, %v1671_v28 }
0x1489   :  { %1675 = vadd.xlane.f32.xlu0 %v1674_v50 }
0x148a   :  { %v1677_v30 = vsel %vm552_vm2, %v1673_v29, 0.0 }
0x148b   :  { %1678 = vadd.xlane.f32.xlu1 %v1677_v30 }
0x1516   :  { %v1676_v33 = vpop.xlane.xlu0 %1675 }
0x1517   :  { %v1680_v35 = vmul.f32 0.03125, %v1676_v33 }
0x1518   :  { %v1679_v36 = vpop.xlane.xlu1 %1678 }
0x1519   :  { %v1682_v37 = vadd.f32 1e-06, %v1680_v35  ;;  %v1681_v38 = vmul.f32 0.03125, %v1679_v36 }
0x151b   :  { %2529 = vrsqrt.f32 %v1682_v37  ;;  %v1683_v39 = vadd.f32 1e-06, %v1681_v38 }
0x151d   :  { %2531 = vrsqrt.f32 %v1683_v39  ;;  %v2479_v39 = vld [vmem:[%s3203_s18] sm:$0xff]  }
0x1525   :  { %v2530_v40 = vpop.eup %2529 }
0x1526   :  { %v1686_v42 = vmul.f32 %v2530_v40, %v1670_v27  ;;  %v2480_v40 = vld [vmem:[%s3203_s18 + $0x8] sm:$0xff]  }
0x1527   :  { %v2532_v43 = vpop.eup %2531 }
0x1528   :  { %v1694_v44 = vmul.f32 %v2111_v41, %v1686_v42  ;;  %v1687_v46 = vmul.f32 %v2532_v43, %v1671_v28 }
0x152a   :  { %v1695_v49 = vmul.f32 %v2111_v41, %v1687_v46  ;;  %v1702_v51 = vadd.f32 %v2112_v47, %v1694_v44 }
0x152c   :  { %v1703_v52 = vadd.f32 %v2112_v47, %v1695_v49 }
0x152e   :  { %v1704_v45 = vpack.c.bf16 %v1703_v52, %v1702_v51  ;;  %v2137_v51 = vld [vmem:[%s3201_s16] ss:$0 sm:$0xff]  ;;  %s2573_s16 = smov [#allocation2]  }
0x152f   :  { %s2001_s2 = sshll.u32 %s2573_s16, 4  ;;  %s2002_s2 = int_to_ptr.vmem [resolvable:$true] %s2001_s2 }
0x1530   :  { %2368 = vmatmul.mubr.msk.bf16.vlgmr.msra.gmra.mrb[36].mxu1 %vm548_vm1, %v1704_v45  ;;  %p2546_p1 = scmp.lt.s32.totalorder %s2002_s2, %s2002_s2 }
0x1531   :  { %2387 = vmatprep.mubr.msk.bf16.mxu1 %vm2566_vm0, %v2565_v34  ;;  %2384 = vmatpush3.bf16.msra.mxu1 %v2479_v39 }
0x1532   :  { %2385 = vmatprep.subr.bf16.mxu1 %v2565_v34  ;;  %v2138_v34 = vld [vmem:[%s3202_s17] ss:$0 sm:$0xff]  ;;  %s2541_s17 = scalar_lea.vmem %s2002_s2, 256 }
0x1533   :  { %p2542_p0 = scmp.ne.s32.totalorder %s2002_s2, %s2541_s17  ;;  %p2547_p2 = scmp.lt.s32.totalorder %s2541_s17, %s2541_s17 }
0x1535   :  { %2386 = vmatpush3.bf16.msra.mxu1 %v2480_v40  ;;  %p2548_p3 = por %p2547_p2, %p2546_p1 }
0x1537   :  { %p2549_p4 = pnand %p2548_p3, %p2542_p0 }
0x1603   :  { %v1767_v58 = vpop.f32.mrb[36].mxu1 }
0x1604   :  { %v1768_v59 = vadd.f32 %v2118_v57, %v1767_v58  ;;  %v2369_v60 = vpop.f32.mrb[37].mxu1 }
0x1605   :  { %v1770_v61 = vpop.f32.mrb[38].mxu1 }
0x1606   :  { %v1776_v62 = vmul.f32 0.044715, %v1768_v59  ;;  %v1771_v63 = vadd.f32 %v2118_v57, %v1770_v61  ;;  %v2370_v0 = vpop.f32.mrb[39].mxu1  ;;  %v1774_v16 = vmul.f32 0.5, %v1768_v59 }
0x1608   :  { %v1778_v2 = vmul.f32 %v1776_v62, %v1768_v59  ;;  %v1777_v3 = vmul.f32 0.044715, %v1771_v63  ;;  %v1775_v17 = vmul.f32 0.5, %v1771_v63 }
0x160a   :  { %v1780_v5 = vmul.f32 %v1778_v2, %v1768_v59  ;;  %v1779_v6 = vmul.f32 %v1777_v3, %v1771_v63 }
0x160c   :  { %v1782_v7 = vadd.f32 %v1780_v5, %v1768_v59  ;;  %v1781_v9 = vmul.f32 %v1779_v6, %v1771_v63  ;;  %v2139_v59 = vld [vmem:[%s3204_s19] ss:$0 sm:$0xff] }
0x160e   :  { %v1784_v10 = vmul.f32 0.7978846, %v1782_v7  ;;  %v1783_v12 = vadd.f32 %v1781_v9, %v1771_v63 }
0x1610   :  { %2533 = vtanh.f32 %v1784_v10  ;;  %v1785_v13 = vmul.f32 0.7978846, %v1783_v12 }
0x1612   :  { %2535 = vtanh.f32 %v1785_v13 }
0x161a   :  { %v2534_v14 = vpop.eup %2533 }
0x161b   :  { %v1788_v15 = vadd.f32 1.0, %v2534_v14 }
0x161c   :  { %v2536_v1 = vpop.eup %2535 }
0x161d   :  { %v1789_v4 = vadd.f32 1.0, %v2536_v1  ;;  %v1790_v19 = vmul.f32 %v1788_v15, %v1774_v16 }
0x161f   :  { %v1791_v22 = vmul.f32 %v1789_v4, %v1775_v17 }
0x1621   :  { %v1792_v23 = vpack.c.bf16 %v1791_v22, %v1790_v19 }
0x1623   :  { %2380 = vmatmul.mubr.msk.bf16.vlgmr.msra.gmra.mrb[32].mxu0 %vm1156_vm7, %v1792_v23 }
0x16f6   :  { %v1863_v8 = vpop.f32.mrb[32].mxu0 }
0x16f7   :  { %v1870_v26 = vadd.f32 %v1863_v8, %v3098_v21  ;;  %v2381_v48 = vpop.f32.mrb[33].mxu0 }
0x16f8   :  { %v1866_v18 = vpop.f32.mrb[34].mxu0 }
0x16f9   :  { %v1871_v27 = vadd.f32 %v1866_v18, %v3101_v24  ;;  %v2382_v11 = vpop.f32.mrb[35].mxu0  ;;  %v1880_v28 = vadd.f32 %v2136_v25, %v1870_v26 }
0x16fb   :  { %v1884_v20 = vsel %vm548_vm1, %v1880_v28, 0.0  ;;  %v1881_v50 = vadd.f32 %v2136_v25, %v1871_v27 }
0x16fc   :  { %1885 = vadd.xlane.f32.xlu0 %v1884_v20 }
0x16fd   :  { %v1887_v29 = vsel %vm552_vm2, %v1881_v50, 0.0 }
0x16fe   :  { %1888 = vadd.xlane.f32.xlu1 %v1887_v29 }
0x1789   :  { %v1886_v30 = vpop.xlane.xlu0 %1885 }
0x178a   :  { %v1890_v31 = vmul.f32 0.03125, %v1886_v30 }
0x178b   :  { %v1889_v32 = vpop.xlane.xlu1 %1888 }
0x178c   :  { %v1892_v33 = vsub.f32 %v1880_v28, %v1890_v31  ;;  %v1891_v35 = vmul.f32 0.03125, %v1889_v32 }
0x178e   :  { %v1893_v36 = vsub.f32 %v1881_v50, %v1891_v35  ;;  %v1894_v21 = vmul.f32 %v1892_v33, %v1892_v33 }
0x1790   :  { %v1896_v37 = vsel %vm548_vm1, %v1894_v21, 0.0  ;;  %v1895_v38 = vmul.f32 %v1893_v36, %v1893_v36 }
0x1791   :  { %1897 = vadd.xlane.f32.xlu0 %v1896_v37 }
0x1792   :  { %v1899_v24 = vsel %vm552_vm2, %v1895_v38, 0.0 }
0x1793   :  { %1900 = vadd.xlane.f32.xlu1 %v1899_v24 }
0x181e   :  { %v1898_v41 = vpop.xlane.xlu0 %1897 }
0x181f   :  { %v1902_v42 = vmul.f32 0.03125, %v1898_v41 }
0x1820   :  { %v1901_v43 = vpop.xlane.xlu1 %1900 }
0x1821   :  { %v1904_v44 = vadd.f32 1e-06, %v1902_v42  ;;  %v1903_v46 = vmul.f32 0.03125, %v1901_v43 }
0x1823   :  { %2537 = vrsqrt.f32 %v1904_v44  ;;  %v1905_v47 = vadd.f32 1e-06, %v1903_v46 }
0x1825   :  { %2539 = vrsqrt.f32 %v1905_v47 }
0x182d   :  { %v2538_v49 = vpop.eup %2537 }
0x182e   :  { %v1908_v52 = vmul.f32 %v2538_v49, %v1892_v33 }
0x182f   :  { %v2540_v45 = vpop.eup %2539 }
0x1830   :  { %v1916_v53 = vmul.f32 %v2137_v51, %v1908_v52  ;;  %v1909_v54 = vmul.f32 %v2540_v45, %v1893_v36 }
0x1832   :  { %v1917_v55 = vmul.f32 %v2137_v51, %v1909_v54  ;;  %v1924_v56 = vadd.f32 %v2138_v34, %v1916_v53 }
0x1834   :  { %v1925_v57 = vadd.f32 %v2138_v34, %v1917_v55 }
0x1836   :  { %v1926_v58 = vpack.c.bf16 %v1925_v57, %v1924_v56 }
0x1838   :  { %2388 = vmatmul.mubr.msk.bf16.vlgmr.msra.gmra.mrb[40].mxu1 %vm548_vm1, %v1926_v58 }
0x190b   :  { %v1987_v60 = vpop.f32.mrb[40].mxu1 }
0x190c   :  { %v1988_v61 = vadd.f32 %v2139_v59, %v1987_v60  ;;  %v2389_v62 = vpop.f32.mrb[41].mxu1 }
0x190d   :  { %v1990_v63 = vpop.f32.mrb[42].mxu1 }
0x190e   :  { %1994 = vst [vmem:[#allocation2] sm:$0xff] %v1988_v61  ;;  %v1991_v0 = vadd.f32 %v2139_v59, %v1990_v63  ;;  %v2390_v2 = vpop.f32.mrb[43].mxu1 }
0x1910   :  { %1995 = vst [vmem:[#allocation2 + $0x8] sm:$0x3] %v1991_v0 }
0x1911   :  { %2552 = shalt.err (!%p2549_p4)
}
0x1912   :  { %s2553_s4 = scalar_lea.hbm %s3205_s20, 256 }
0x1913   :  { %p2554_p5 = scmp.ne.s32.totalorder %s3205_s20, %s2553_s4  ;;  %p2557_p6 = scmp.lt.u32.totalorder %s2553_s4, %s3205_s20 }
0x1915   :  { %p2559_p7 = pnand %p2557_p6, %p2554_p5 }
0x1917   :  { %2562 = shalt.err (!%p2559_p7)
}
0x1918   :  { %s2574_s10 = smov 128   ;;  %s2575_s22 = smov 8  }
0x1919   :  { %2007 = dma.vmem_to_hbm [thread:$0]  %s2002_s2, 256, %s3205_s20, [#allocation3], %s2574_s10, %s2574_s10, %s2575_s22  }
0x191a   :  { %2563 = dma.done.wait [#allocation3], 256  }
0x191b   :  { %2564 = vsyncadd [#allocation3], 4294967040 }
0x191c   :  { %2011 = vsyncpa [#allocation3], 1 }

</bundles_post_ra>
